<compile_context>
chip_gen: v6e
topology: v6e:2x2x1
jax: 0.10.0
libtpu: 0.0.40
codegen_flags: <defaults>
</compile_context>

<pallas_src>
import functools

import jax
import jax.numpy as jnp
from jax.experimental import pallas as pl
from jax.experimental.pallas import tpu as pltpu

BN_EPS = 1e-5                       # PyTorch BatchNorm1d default
VMEM_LIMIT = 32 * 1024 * 1024       # safe on v5e/v6e/v7x; actual use ~1-4 MiB


def _round_up(x, m):
    return (x + m - 1) // m * m


def make_kernel(upto, d_input, is_stats, M, TM):
    """Kernel computing the MLP through conv layer `upto` on one (C, TM) tile.

    BN (precomputed per-channel scale/shift) + ReLU is applied after convs
    0..upto-1.  If `is_stats`, the kernel accumulates per-channel sum and
    sum-of-squares of conv-`upto`'s output into two resident output blocks
    (grid axis must be "arbitrary"); otherwise it writes the (C_out, TM)
    activation tile (grid axis "parallel").

    Ref order: x_tile, w_0..w_upto, b_0..b_upto, scale_0..scale_{upto-1},
    shift_0..shift_{upto-1}, then output ref(s).
    """
    nw = upto + 1          # number of conv layers evaluated
    nbn = upto             # number of BN(scale, shift)+ReLU blocks applied
    need_mask = is_stats and (M % TM != 0)

    def kernel(*refs):
        x_ref = refs[0]
        w_refs = refs[1:1 + nw]
        b_refs = refs[1 + nw:1 + 2 * nw]
        sc_refs = refs[1 + 2 * nw:1 + 2 * nw + nbn]
        sh_refs = refs[1 + 2 * nw + nbn:1 + 2 * nw + 2 * nbn]
        outs = refs[1 + 2 * nw + 2 * nbn:]

        x = x_ref[...]                     # (d_input, TM) f32, lane-dense in M
        w0 = w_refs[0][...]                # (C1, d_input)

        # Layer 0: K = d_input (= 3) is far too small for the MXU -> express as
        # d_input broadcast FMAs on the VPU (outer-product accumulation).
        h = w0[:, 0:1] * x[0:1, :]
        for k in range(1, d_input):
            h = h + w0[:, k:k + 1] * x[k:k + 1, :]
        h = h + b_refs[0][...]             # (C1, TM)

        # Hidden/output layers: BN(scale,shift) + ReLU fused, conv on the MXU.
        for j in range(1, nw):
            h = jnp.maximum(h * sc_refs[j - 1][...] + sh_refs[j - 1][...], 0.0)
            h = (
                jnp.dot(w_refs[j][...], h, preferred_element_type=jnp.float32)
                + b_refs[j][...]
            )

        if is_stats:
            sum_ref, sq_ref = outs
            i = pl.program_id(0)

            @pl.when(i == 0)
            def _():
                sum_ref[...] = jnp.zeros_like(sum_ref)
                sq_ref[...] = jnp.zeros_like(sq_ref)

            if need_mask:
                col = i * TM + jax.lax.broadcasted_iota(jnp.int32, (1, TM), 1)
                hm = jnp.where(col < M, h, 0.0)
            else:
                hm = h
            sum_ref[...] += jnp.sum(hm, axis=1, keepdims=True)
            sq_ref[...] += jnp.sum(hm * hm, axis=1, keepdims=True)
        else:
            (o_ref,) = outs
            o_ref[...] = h.astype(o_ref.dtype)

    return kernel


def init_params(key, channels):
    """Deterministic params matching the module's shapes.

    channels = (3,) + layers + (feature_dim,).
    Conv weights stored (C_out, C_in) == PyTorch Conv1d weight squeezed (k=1).
    """
    n = len(channels)
    ws, bs, gammas, betas = [], [], [], []
    for i in range(1, n):
        c_in, c_out = channels[i - 1], channels[i]
        key, kw, kb = jax.random.split(key, 3)
        ws.append(jax.random.normal(kw, (c_out, c_in), jnp.float32) * 0.1)
        if i == n - 1:
            bs.append(jnp.zeros((c_out, 1), jnp.float32))   # constant_(bias, 0.0)
        else:
            bs.append(jax.random.normal(kb, (c_out, 1), jnp.float32) * 0.01)
        if i < n - 1:
            gammas.append(jnp.ones((c_out, 1), jnp.float32))   # BN defaults
            betas.append(jnp.zeros((c_out, 1), jnp.float32))
    return {"w": ws, "b": bs, "gamma": gammas, "beta": betas}


@functools.partial(jax.jit, static_argnums=(3, 4))
def word_positional_encoder(words_in_line, scores_in_line, params, channels,
                            tile_m=2048):
    B, S, W, dw = words_in_line.shape
    ds = scores_in_line.shape[-1]
    d_input = dw + ds
    assert d_input == channels[0]
    F = channels[-1]
    L = len(channels) - 1          # number of conv layers
    M = B * S * W

    # Tile size: multiple of 128 lanes, capped by (padded) M.
    TM = min(_round_up(tile_m, 128), _round_up(M, 128))
    M_pad = _round_up(M, TM)
    grid = (M_pad // TM,)

    # Glue: build the channels-first (d_input, M) slab directly from the two
    # inputs (no (M,3) concat materialization), zero-pad M to a tile multiple.
    chans = [words_in_line[..., k].reshape(M) for k in range(dw)]
    chans += [scores_in_line[..., k].reshape(M) for k in range(ds)]
    x = jnp.stack(chans, axis=0).astype(jnp.float32)          # (d_input, M)
    if M_pad != M:
        x = jnp.pad(x, ((0, 0), (0, M_pad - M)))

    weights, biases = params["w"], params["b"]
    gammas, betas = params["gamma"], params["beta"]

    x_spec = pl.BlockSpec((d_input, TM), lambda i: (0, i))

    def param_spec(p):
        # Full-array block, constant index -> stays VMEM-resident across steps.
        return pl.BlockSpec(p.shape, lambda i: (0, 0))

    # ---- per-BN-layer statistics passes (global mean/var over all M rows) ----
    scales, shifts = [], []
    for j in range(L - 1):
        C = channels[j + 1]
        kern = make_kernel(upto=j, d_input=d_input, is_stats=True, M=M, TM=TM)
        in_list = ([x] + list(weights[:j + 1]) + list(biases[:j + 1])
                   + list(scales) + list(shifts))
        in_specs = [x_spec] + [param_spec(p) for p in in_list[1:]]
        ssum, ssq = pl.pallas_call(
            kern,
            grid=grid,
            out_shape=(jax.ShapeDtypeStruct((C, 1), jnp.float32),
                       jax.ShapeDtypeStruct((C, 1), jnp.float32)),
            in_specs=in_specs,
            out_specs=(pl.BlockSpec((C, 1), lambda i: (0, 0)),
                       pl.BlockSpec((C, 1), lambda i: (0, 0))),
            compiler_params=pltpu.CompilerParams(
                dimension_semantics=("arbitrary",),
                vmem_limit_bytes=VMEM_LIMIT),
        )(*in_list)
        mean = ssum / M
        var = jnp.maximum(ssq / M - mean * mean, 0.0)          # biased, training-mode
        invstd = jax.lax.rsqrt(var + BN_EPS)
        scales.append(gammas[j] * invstd)
        shifts.append(betas[j] - mean * gammas[j] * invstd)

    # ---- final fused forward pass (row-parallel over M tiles) ----
    kern = make_kernel(upto=L - 1, d_input=d_input, is_stats=False, M=M, TM=TM)
    in_list = [x] + list(weights) + list(biases) + list(scales) + list(shifts)
    in_specs = [x_spec] + [param_spec(p) for p in in_list[1:]]
    out = pl.pallas_call(
        kern,
        grid=grid,
        out_shape=jax.ShapeDtypeStruct((F, M_pad), jnp.float32),
        in_specs=in_specs,
        out_specs=pl.BlockSpec((F, TM), lambda i: (0, i)),
        compiler_params=pltpu.CompilerParams(
            dimension_semantics=("parallel",),
            vmem_limit_bytes=VMEM_LIMIT),
    )(*in_list)

    out = out[:, :M]                                           # drop padding
    return out.T.reshape(B, S, W, F)


def reference_forward(words_in_line, scores_in_line, params, channels):
    """Pure-JAX f32 reference of the same math (channels-last)."""
    B, S, W, _ = words_in_line.shape
    x = jnp.concatenate([words_in_line, scores_in_line], axis=-1).reshape(
        B * S * W, channels[0]).astype(jnp.float32)
    L = len(channels) - 1
    h = x
    for j in range(L):
        w, b = params["w"][j], params["b"][j]
        h = h @ w.T + b[:, 0]
        if j < L - 1:
            g, be = params["gamma"][j][:, 0], params["beta"][j][:, 0]
            mean = jnp.mean(h, axis=0, keepdims=True)
            var = jnp.mean((h - mean) ** 2, axis=0, keepdims=True)
            h = (h - mean) * jax.lax.rsqrt(var + BN_EPS) * g + be
            h = jnp.maximum(h, 0.0)
    return h.reshape(B, S, W, channels[-1])


if __name__ == "__main__":
    # TODO(synk): eval-mode BatchNorm (running_mean/var) is not represented;
    # this matches the PyTorch module in training mode (batch statistics).
    def run_case(B, S, W, layers, feature_dim, key):
        channels = tuple([3] + list(layers) + [feature_dim])
        k1, k2, k3 = jax.random.split(key, 3)
        words_in_line = jax.random.normal(k1, (B, S, W, 2), jnp.float32)
        scores_in_line = jax.random.uniform(k2, (B, S, W, 1), jnp.float32)
        params = init_params(k3, channels)
        out = word_positional_encoder(words_in_line, scores_in_line, params,
                                      channels, 2048)
        out = jax.block_until_ready(out)
        ref = reference_forward(words_in_line, scores_in_line, params, channels)
        assert out.shape == (B, S, W, feature_dim)
        err = float(jnp.max(jnp.abs(out - ref)))
        assert jnp.allclose(out, ref, atol=1e-3, rtol=1e-3), err

    key = jax.random.PRNGKey(0)
    k1, k2 = jax.random.split(key)
    run_case(2, 4, 16, [32, 64], 32, k1)   # M = 128: exact single tile
    run_case(2, 3, 10, [32, 64], 32, k2)   # M = 60: exercises pad + stats mask
    print("KERNEL_OK")
</pallas_src>

<mosaic_0001>
module attributes {stable_mosaic.version = 11 : i64} {
  func.func @kernel(%arg0: i32, %arg1: memref<3x128xf32, #tpu.memory_space<vmem>>, %arg2: memref<32x3xf32, #tpu.memory_space<vmem>>, %arg3: memref<64x32xf32, #tpu.memory_space<vmem>>, %arg4: memref<32x1xf32, #tpu.memory_space<vmem>>, %arg5: memref<64x1xf32, #tpu.memory_space<vmem>>, %arg6: memref<32x1xf32, #tpu.memory_space<vmem>>, %arg7: memref<32x1xf32, #tpu.memory_space<vmem>>, %arg8: memref<64x1xf32, #tpu.memory_space<vmem>>, %arg9: memref<64x1xf32, #tpu.memory_space<vmem>>) attributes {dimension_semantics = [#tpu.dimension_semantics<arbitrary>], iteration_bounds = array<i64: 1>, scalar_prefetch = 0 : i64, scratch_operands = 0 : i64, tpu.core_type = #tpu.core_type<tc>, window_params = [{transform_indices = @transform_0, window_bounds = array<i64: 3, 128>}, {pipeline_mode = #tpu.pipeline_mode<synchronous>, transform_indices = @transform_1, window_bounds = array<i64: 32, 3>}, {pipeline_mode = #tpu.pipeline_mode<synchronous>, transform_indices = @transform_2, window_bounds = array<i64: 64, 32>}, {pipeline_mode = #tpu.pipeline_mode<synchronous>, transform_indices = @transform_3, window_bounds = array<i64: 32, 1>}, {pipeline_mode = #tpu.pipeline_mode<synchronous>, transform_indices = @transform_4, window_bounds = array<i64: 64, 1>}, {pipeline_mode = #tpu.pipeline_mode<synchronous>, transform_indices = @transform_5, window_bounds = array<i64: 32, 1>}, {pipeline_mode = #tpu.pipeline_mode<synchronous>, transform_indices = @transform_6, window_bounds = array<i64: 32, 1>}, {pipeline_mode = #tpu.pipeline_mode<synchronous>, transform_indices = @transform_7, window_bounds = array<i64: 64, 1>}, {pipeline_mode = #tpu.pipeline_mode<synchronous>, transform_indices = @transform_8, window_bounds = array<i64: 64, 1>}]} {
    %c0 = arith.constant 0 : index
    %c0_0 = arith.constant 0 : index
    %0 = vector.load %arg1[%c0, %c0_0] : memref<3x128xf32, #tpu.memory_space<vmem>>, vector<3x128xf32>
    %c0_1 = arith.constant 0 : index
    %c0_2 = arith.constant 0 : index
    %1 = vector.load %arg2[%c0_1, %c0_2] : memref<32x3xf32, #tpu.memory_space<vmem>>, vector<32x3xf32>
    %2 = vector.extract_strided_slice %1 {offsets = [0, 0], sizes = [32, 1], strides = [1, 1]} : vector<32x3xf32> to vector<32x1xf32>
    %3 = vector.extract_strided_slice %0 {offsets = [0, 0], sizes = [1, 128], strides = [1, 1]} : vector<3x128xf32> to vector<1x128xf32>
    %4 = vector.broadcast %2 : vector<32x1xf32> to vector<32x128xf32>
    %5 = vector.broadcast %3 : vector<1x128xf32> to vector<32x128xf32>
    %6 = arith.mulf %4, %5 : vector<32x128xf32>
    %7 = vector.extract_strided_slice %1 {offsets = [0, 1], sizes = [32, 1], strides = [1, 1]} : vector<32x3xf32> to vector<32x1xf32>
    %8 = vector.extract_strided_slice %0 {offsets = [1, 0], sizes = [1, 128], strides = [1, 1]} : vector<3x128xf32> to vector<1x128xf32>
    %9 = vector.broadcast %7 : vector<32x1xf32> to vector<32x128xf32>
    %10 = vector.broadcast %8 : vector<1x128xf32> to vector<32x128xf32>
    %11 = arith.mulf %9, %10 : vector<32x128xf32>
    %12 = arith.addf %6, %11 : vector<32x128xf32>
    %13 = vector.extract_strided_slice %1 {offsets = [0, 2], sizes = [32, 1], strides = [1, 1]} : vector<32x3xf32> to vector<32x1xf32>
    %14 = vector.extract_strided_slice %0 {offsets = [2, 0], sizes = [1, 128], strides = [1, 1]} : vector<3x128xf32> to vector<1x128xf32>
    %15 = vector.broadcast %13 : vector<32x1xf32> to vector<32x128xf32>
    %16 = vector.broadcast %14 : vector<1x128xf32> to vector<32x128xf32>
    %17 = arith.mulf %15, %16 : vector<32x128xf32>
    %18 = arith.addf %12, %17 : vector<32x128xf32>
    %c0_3 = arith.constant 0 : index
    %c0_4 = arith.constant 0 : index
    %19 = vector.load %arg4[%c0_3, %c0_4] : memref<32x1xf32, #tpu.memory_space<vmem>>, vector<32x1xf32>
    %20 = vector.broadcast %19 : vector<32x1xf32> to vector<32x128xf32>
    %21 = arith.addf %18, %20 : vector<32x128xf32>
    %c0_5 = arith.constant 0 : index
    %c0_6 = arith.constant 0 : index
    %22 = vector.load %arg6[%c0_5, %c0_6] : memref<32x1xf32, #tpu.memory_space<vmem>>, vector<32x1xf32>
    %23 = vector.broadcast %22 : vector<32x1xf32> to vector<32x128xf32>
    %24 = arith.mulf %21, %23 : vector<32x128xf32>
    %c0_7 = arith.constant 0 : index
    %c0_8 = arith.constant 0 : index
    %25 = vector.load %arg7[%c0_7, %c0_8] : memref<32x1xf32, #tpu.memory_space<vmem>>, vector<32x1xf32>
    %26 = vector.broadcast %25 : vector<32x1xf32> to vector<32x128xf32>
    %27 = arith.addf %24, %26 : vector<32x128xf32>
    %cst = arith.constant 0.000000e+00 : f32
    %28 = vector.broadcast %cst : f32 to vector<32x128xf32>
    %29 = arith.maximumf %27, %28 : vector<32x128xf32>
    %c0_9 = arith.constant 0 : index
    %c0_10 = arith.constant 0 : index
    %30 = vector.load %arg3[%c0_9, %c0_10] : memref<64x32xf32, #tpu.memory_space<vmem>>, vector<64x32xf32>
    %cst_11 = arith.constant dense<0.000000e+00> : vector<64x128xf32>
    %31 = tpu.matmul %30, %29, %cst_11 {dimension_numbers = #tpu.dot_dimension_numbers<[1], [0], [0], [1], [0, 0, 1, 1], [], []>} : vector<64x32xf32>, vector<32x128xf32>, vector<64x128xf32> -> vector<64x128xf32>
    %c0_12 = arith.constant 0 : index
    %c0_13 = arith.constant 0 : index
    %32 = vector.load %arg5[%c0_12, %c0_13] : memref<64x1xf32, #tpu.memory_space<vmem>>, vector<64x1xf32>
    %33 = vector.broadcast %32 : vector<64x1xf32> to vector<64x128xf32>
    %34 = arith.addf %31, %33 : vector<64x128xf32>
    %c0_i32 = arith.constant 0 : i32
    %35 = arith.cmpi eq, %arg0, %c0_i32 : i32
    %36 = arith.extui %35 : i1 to i32
    %c0_i32_14 = arith.constant 0 : i32
    %37 = arith.cmpi ne, %36, %c0_i32_14 : i32
    scf.if %37 {
      %cst_25 = arith.constant 0.000000e+00 : f32
      %49 = vector.broadcast %cst_25 : f32 to vector<64x1xf32>
      %c0_26 = arith.constant 0 : index
      %c0_27 = arith.constant 0 : index
      %50 = vector.load %arg8[%c0_26, %c0_27] : memref<64x1xf32, #tpu.memory_space<vmem>>, vector<64x1xf32>
      tpu.vector_store %arg8[%c0_26, %c0_27], %49 {strides = array<i32>} : memref<64x1xf32, #tpu.memory_space<vmem>>, vector<64x1xf32>,
      %cst_28 = arith.constant 0.000000e+00 : f32
      %51 = vector.broadcast %cst_28 : f32 to vector<64x1xf32>
      %c0_29 = arith.constant 0 : index
      %c0_30 = arith.constant 0 : index
      %52 = vector.load %arg9[%c0_29, %c0_30] : memref<64x1xf32, #tpu.memory_space<vmem>>, vector<64x1xf32>
      tpu.vector_store %arg9[%c0_29, %c0_30], %51 {strides = array<i32>} : memref<64x1xf32, #tpu.memory_space<vmem>>, vector<64x1xf32>,
    } else {
    }
    %c0_15 = arith.constant 0 : index
    %c0_16 = arith.constant 0 : index
    %38 = vector.load %arg8[%c0_15, %c0_16] : memref<64x1xf32, #tpu.memory_space<vmem>>, vector<64x1xf32>
    %cst_17 = arith.constant dense<0.000000e+00> : vector<64xf32>
    %39 = vector.multi_reduction <add>, %34, %cst_17 [1] : vector<64x128xf32> to vector<64xf32>
    %40 = vector.shape_cast %39 : vector<64xf32> to vector<64x1xf32>
    %41 = arith.addf %38, %40 : vector<64x1xf32>
    %c0_18 = arith.constant 0 : index
    %c0_19 = arith.constant 0 : index
    %42 = vector.load %arg8[%c0_18, %c0_19] : memref<64x1xf32, #tpu.memory_space<vmem>>, vector<64x1xf32>
    tpu.vector_store %arg8[%c0_18, %c0_19], %41 {strides = array<i32>} : memref<64x1xf32, #tpu.memory_space<vmem>>, vector<64x1xf32>,
    %c0_20 = arith.constant 0 : index
    %c0_21 = arith.constant 0 : index
    %43 = vector.load %arg9[%c0_20, %c0_21] : memref<64x1xf32, #tpu.memory_space<vmem>>, vector<64x1xf32>
    %44 = arith.mulf %34, %34 : vector<64x128xf32>
    %cst_22 = arith.constant dense<0.000000e+00> : vector<64xf32>
    %45 = vector.multi_reduction <add>, %44, %cst_22 [1] : vector<64x128xf32> to vector<64xf32>
    %46 = vector.shape_cast %45 : vector<64xf32> to vector<64x1xf32>
    %47 = arith.addf %43, %46 : vector<64x1xf32>
    %c0_23 = arith.constant 0 : index
    %c0_24 = arith.constant 0 : index
    %48 = vector.load %arg9[%c0_23, %c0_24] : memref<64x1xf32, #tpu.memory_space<vmem>>, vector<64x1xf32>
    tpu.vector_store %arg9[%c0_23, %c0_24], %47 {strides = array<i32>} : memref<64x1xf32, #tpu.memory_space<vmem>>, vector<64x1xf32>,
    return
  }
  func.func @transform_0(%arg0: i32) -> (i32, i32) {
    %c0_i32 = arith.constant 0 : i32
    %c0_i32_0 = arith.constant 0 : i32
    return %c0_i32, %arg0 : i32, i32
  }
  func.func @transform_1(%arg0: i32) -> (i32, i32) {
    %c0_i32 = arith.constant 0 : i32
    %c0_i32_0 = arith.constant 0 : i32
    %c0_i32_1 = arith.constant 0 : i32
    return %c0_i32, %c0_i32_0 : i32, i32
  }
  func.func @transform_2(%arg0: i32) -> (i32, i32) {
    %c0_i32 = arith.constant 0 : i32
    %c0_i32_0 = arith.constant 0 : i32
    %c0_i32_1 = arith.constant 0 : i32
    return %c0_i32, %c0_i32_0 : i32, i32
  }
  func.func @transform_3(%arg0: i32) -> (i32, i32) {
    %c0_i32 = arith.constant 0 : i32
    %c0_i32_0 = arith.constant 0 : i32
    %c0_i32_1 = arith.constant 0 : i32
    return %c0_i32, %c0_i32_0 : i32, i32
  }
  func.func @transform_4(%arg0: i32) -> (i32, i32) {
    %c0_i32 = arith.constant 0 : i32
    %c0_i32_0 = arith.constant 0 : i32
    %c0_i32_1 = arith.constant 0 : i32
    return %c0_i32, %c0_i32_0 : i32, i32
  }
  func.func @transform_5(%arg0: i32) -> (i32, i32) {
    %c0_i32 = arith.constant 0 : i32
    %c0_i32_0 = arith.constant 0 : i32
    %c0_i32_1 = arith.constant 0 : i32
    return %c0_i32, %c0_i32_0 : i32, i32
  }
  func.func @transform_6(%arg0: i32) -> (i32, i32) {
    %c0_i32 = arith.constant 0 : i32
    %c0_i32_0 = arith.constant 0 : i32
    %c0_i32_1 = arith.constant 0 : i32
    return %c0_i32, %c0_i32_0 : i32, i32
  }
  func.func @transform_7(%arg0: i32) -> (i32, i32) {
    %c0_i32 = arith.constant 0 : i32
    %c0_i32_0 = arith.constant 0 : i32
    %c0_i32_1 = arith.constant 0 : i32
    return %c0_i32, %c0_i32_0 : i32, i32
  }
  func.func @transform_8(%arg0: i32) -> (i32, i32) {
    %c0_i32 = arith.constant 0 : i32
    %c0_i32_0 = arith.constant 0 : i32
    %c0_i32_1 = arith.constant 0 : i32
    return %c0_i32, %c0_i32_0 : i32, i32
  }
}

module attributes {stable_mosaic.version = 11 : i64} {
  func.func @kernel(%arg0: i32, %arg1: memref<3x128xf32, #tpu.memory_space<vmem>>, %arg2: memref<32x3xf32, #tpu.memory_space<vmem>>, %arg3: memref<32x1xf32, #tpu.memory_space<vmem>>, %arg4: memref<32x1xf32, #tpu.memory_space<vmem>>, %arg5: memref<32x1xf32, #tpu.memory_space<vmem>>) attributes {dimension_semantics = [#tpu.dimension_semantics<arbitrary>], iteration_bounds = array<i64: 1>, scalar_prefetch = 0 : i64, scratch_operands = 0 : i64, tpu.core_type = #tpu.core_type<tc>, window_params = [{transform_indices = @transform_0, window_bounds = array<i64: 3, 128>}, {pipeline_mode = #tpu.pipeline_mode<synchronous>, transform_indices = @transform_1, window_bounds = array<i64: 32, 3>}, {pipeline_mode = #tpu.pipeline_mode<synchronous>, transform_indices = @transform_2, window_bounds = array<i64: 32, 1>}, {pipeline_mode = #tpu.pipeline_mode<synchronous>, transform_indices = @transform_3, window_bounds = array<i64: 32, 1>}, {pipeline_mode = #tpu.pipeline_mode<synchronous>, transform_indices = @transform_4, window_bounds = array<i64: 32, 1>}]} {
    %c0 = arith.constant 0 : index
    %c0_0 = arith.constant 0 : index
    %0 = vector.load %arg1[%c0, %c0_0] : memref<3x128xf32, #tpu.memory_space<vmem>>, vector<3x128xf32>
    %c0_1 = arith.constant 0 : index
    %c0_2 = arith.constant 0 : index
    %1 = vector.load %arg2[%c0_1, %c0_2] : memref<32x3xf32, #tpu.memory_space<vmem>>, vector<32x3xf32>
    %2 = vector.extract_strided_slice %1 {offsets = [0, 0], sizes = [32, 1], strides = [1, 1]} : vector<32x3xf32> to vector<32x1xf32>
    %3 = vector.extract_strided_slice %0 {offsets = [0, 0], sizes = [1, 128], strides = [1, 1]} : vector<3x128xf32> to vector<1x128xf32>
    %4 = vector.broadcast %2 : vector<32x1xf32> to vector<32x128xf32>
    %5 = vector.broadcast %3 : vector<1x128xf32> to vector<32x128xf32>
    %6 = arith.mulf %4, %5 : vector<32x128xf32>
    %7 = vector.extract_strided_slice %1 {offsets = [0, 1], sizes = [32, 1], strides = [1, 1]} : vector<32x3xf32> to vector<32x1xf32>
    %8 = vector.extract_strided_slice %0 {offsets = [1, 0], sizes = [1, 128], strides = [1, 1]} : vector<3x128xf32> to vector<1x128xf32>
    %9 = vector.broadcast %7 : vector<32x1xf32> to vector<32x128xf32>
    %10 = vector.broadcast %8 : vector<1x128xf32> to vector<32x128xf32>
    %11 = arith.mulf %9, %10 : vector<32x128xf32>
    %12 = arith.addf %6, %11 : vector<32x128xf32>
    %13 = vector.extract_strided_slice %1 {offsets = [0, 2], sizes = [32, 1], strides = [1, 1]} : vector<32x3xf32> to vector<32x1xf32>
    %14 = vector.extract_strided_slice %0 {offsets = [2, 0], sizes = [1, 128], strides = [1, 1]} : vector<3x128xf32> to vector<1x128xf32>
    %15 = vector.broadcast %13 : vector<32x1xf32> to vector<32x128xf32>
    %16 = vector.broadcast %14 : vector<1x128xf32> to vector<32x128xf32>
    %17 = arith.mulf %15, %16 : vector<32x128xf32>
    %18 = arith.addf %12, %17 : vector<32x128xf32>
    %c0_3 = arith.constant 0 : index
    %c0_4 = arith.constant 0 : index
    %19 = vector.load %arg3[%c0_3, %c0_4] : memref<32x1xf32, #tpu.memory_space<vmem>>, vector<32x1xf32>
    %20 = vector.broadcast %19 : vector<32x1xf32> to vector<32x128xf32>
    %21 = arith.addf %18, %20 : vector<32x128xf32>
    %c0_i32 = arith.constant 0 : i32
    %22 = arith.cmpi eq, %arg0, %c0_i32 : i32
    %23 = arith.extui %22 : i1 to i32
    %c0_i32_5 = arith.constant 0 : i32
    %24 = arith.cmpi ne, %23, %c0_i32_5 : i32
    scf.if %24 {
      %cst_15 = arith.constant 0.000000e+00 : f32
      %36 = vector.broadcast %cst_15 : f32 to vector<32x1xf32>
      %c0_16 = arith.constant 0 : index
      %c0_17 = arith.constant 0 : index
      %37 = vector.load %arg4[%c0_16, %c0_17] : memref<32x1xf32, #tpu.memory_space<vmem>>, vector<32x1xf32>
      tpu.vector_store %arg4[%c0_16, %c0_17], %36 {strides = array<i32>} : memref<32x1xf32, #tpu.memory_space<vmem>>, vector<32x1xf32>,
      %cst_18 = arith.constant 0.000000e+00 : f32
      %38 = vector.broadcast %cst_18 : f32 to vector<32x1xf32>
      %c0_19 = arith.constant 0 : index
      %c0_20 = arith.constant 0 : index
      %39 = vector.load %arg5[%c0_19, %c0_20] : memref<32x1xf32, #tpu.memory_space<vmem>>, vector<32x1xf32>
      tpu.vector_store %arg5[%c0_19, %c0_20], %38 {strides = array<i32>} : memref<32x1xf32, #tpu.memory_space<vmem>>, vector<32x1xf32>,
    } else {
    }
    %c0_6 = arith.constant 0 : index
    %c0_7 = arith.constant 0 : index
    %25 = vector.load %arg4[%c0_6, %c0_7] : memref<32x1xf32, #tpu.memory_space<vmem>>, vector<32x1xf32>
    %cst = arith.constant dense<0.000000e+00> : vector<32xf32>
    %26 = vector.multi_reduction <add>, %21, %cst [1] : vector<32x128xf32> to vector<32xf32>
    %27 = vector.shape_cast %26 : vector<32xf32> to vector<32x1xf32>
    %28 = arith.addf %25, %27 : vector<32x1xf32>
    %c0_8 = arith.constant 0 : index
    %c0_9 = arith.constant 0 : index
    %29 = vector.load %arg4[%c0_8, %c0_9] : memref<32x1xf32, #tpu.memory_space<vmem>>, vector<32x1xf32>
    tpu.vector_store %arg4[%c0_8, %c0_9], %28 {strides = array<i32>} : memref<32x1xf32, #tpu.memory_space<vmem>>, vector<32x1xf32>,
    %c0_10 = arith.constant 0 : index
    %c0_11 = arith.constant 0 : index
    %30 = vector.load %arg5[%c0_10, %c0_11] : memref<32x1xf32, #tpu.memory_space<vmem>>, vector<32x1xf32>
    %31 = arith.mulf %21, %21 : vector<32x128xf32>
    %cst_12 = arith.constant dense<0.000000e+00> : vector<32xf32>
    %32 = vector.multi_reduction <add>, %31, %cst_12 [1] : vector<32x128xf32> to vector<32xf32>
    %33 = vector.shape_cast %32 : vector<32xf32> to vector<32x1xf32>
    %34 = arith.addf %30, %33 : vector<32x1xf32>
    %c0_13 = arith.constant 0 : index
    %c0_14 = arith.constant 0 : index
    %35 = vector.load %arg5[%c0_13, %c0_14] : memref<32x1xf32, #tpu.memory_space<vmem>>, vector<32x1xf32>
    tpu.vector_store %arg5[%c0_13, %c0_14], %34 {strides = array<i32>} : memref<32x1xf32, #tpu.memory_space<vmem>>, vector<32x1xf32>,
    return
  }
  func.func @transform_0(%arg0: i32) -> (i32, i32) {
    %c0_i32 = arith.constant 0 : i32
    %c0_i32_0 = arith.constant 0 : i32
    return %c0_i32, %arg0 : i32, i32
  }
  func.func @transform_1(%arg0: i32) -> (i32, i32) {
    %c0_i32 = arith.constant 0 : i32
    %c0_i32_0 = arith.constant 0 : i32
    %c0_i32_1 = arith.constant 0 : i32
    return %c0_i32, %c0_i32_0 : i32, i32
  }
  func.func @transform_2(%arg0: i32) -> (i32, i32) {
    %c0_i32 = arith.constant 0 : i32
    %c0_i32_0 = arith.constant 0 : i32
    %c0_i32_1 = arith.constant 0 : i32
    return %c0_i32, %c0_i32_0 : i32, i32
  }
  func.func @transform_3(%arg0: i32) -> (i32, i32) {
    %c0_i32 = arith.constant 0 : i32
    %c0_i32_0 = arith.constant 0 : i32
    %c0_i32_1 = arith.constant 0 : i32
    return %c0_i32, %c0_i32_0 : i32, i32
  }
  func.func @transform_4(%arg0: i32) -> (i32, i32) {
    %c0_i32 = arith.constant 0 : i32
    %c0_i32_0 = arith.constant 0 : i32
    %c0_i32_1 = arith.constant 0 : i32
    return %c0_i32, %c0_i32_0 : i32, i32
  }
}

module attributes {stable_mosaic.version = 11 : i64} {
  func.func @kernel(%arg0: i32, %arg1: memref<3x128xf32, #tpu.memory_space<vmem>>, %arg2: memref<32x3xf32, #tpu.memory_space<vmem>>, %arg3: memref<64x32xf32, #tpu.memory_space<vmem>>, %arg4: memref<32x64xf32, #tpu.memory_space<vmem>>, %arg5: memref<32x1xf32, #tpu.memory_space<vmem>>, %arg6: memref<64x1xf32, #tpu.memory_space<vmem>>, %arg7: memref<32x1xf32, #tpu.memory_space<vmem>>, %arg8: memref<32x1xf32, #tpu.memory_space<vmem>>, %arg9: memref<64x1xf32, #tpu.memory_space<vmem>>, %arg10: memref<32x1xf32, #tpu.memory_space<vmem>>, %arg11: memref<64x1xf32, #tpu.memory_space<vmem>>, %arg12: memref<32x128xf32, #tpu.memory_space<vmem>>) attributes {dimension_semantics = [#tpu.dimension_semantics<parallel>], iteration_bounds = array<i64: 1>, scalar_prefetch = 0 : i64, scratch_operands = 0 : i64, tpu.core_type = #tpu.core_type<tc>, window_params = [{transform_indices = @transform_0, window_bounds = array<i64: 3, 128>}, {pipeline_mode = #tpu.pipeline_mode<synchronous>, transform_indices = @transform_1, window_bounds = array<i64: 32, 3>}, {pipeline_mode = #tpu.pipeline_mode<synchronous>, transform_indices = @transform_2, window_bounds = array<i64: 64, 32>}, {pipeline_mode = #tpu.pipeline_mode<synchronous>, transform_indices = @transform_3, window_bounds = array<i64: 32, 64>}, {pipeline_mode = #tpu.pipeline_mode<synchronous>, transform_indices = @transform_4, window_bounds = array<i64: 32, 1>}, {pipeline_mode = #tpu.pipeline_mode<synchronous>, transform_indices = @transform_5, window_bounds = array<i64: 64, 1>}, {pipeline_mode = #tpu.pipeline_mode<synchronous>, transform_indices = @transform_6, window_bounds = array<i64: 32, 1>}, {pipeline_mode = #tpu.pipeline_mode<synchronous>, transform_indices = @transform_7, window_bounds = array<i64: 32, 1>}, {pipeline_mode = #tpu.pipeline_mode<synchronous>, transform_indices = @transform_8, window_bounds = array<i64: 64, 1>}, {pipeline_mode = #tpu.pipeline_mode<synchronous>, transform_indices = @transform_9, window_bounds = array<i64: 32, 1>}, {pipeline_mode = #tpu.pipeline_mode<synchronous>, transform_indices = @transform_10, window_bounds = array<i64: 64, 1>}, {transform_indices = @transform_11, window_bounds = array<i64: 32, 128>}]} {
    %c0 = arith.constant 0 : index
    %c0_0 = arith.constant 0 : index
    %0 = vector.load %arg1[%c0, %c0_0] : memref<3x128xf32, #tpu.memory_space<vmem>>, vector<3x128xf32>
    %c0_1 = arith.constant 0 : index
    %c0_2 = arith.constant 0 : index
    %1 = vector.load %arg2[%c0_1, %c0_2] : memref<32x3xf32, #tpu.memory_space<vmem>>, vector<32x3xf32>
    %2 = vector.extract_strided_slice %1 {offsets = [0, 0], sizes = [32, 1], strides = [1, 1]} : vector<32x3xf32> to vector<32x1xf32>
    %3 = vector.extract_strided_slice %0 {offsets = [0, 0], sizes = [1, 128], strides = [1, 1]} : vector<3x128xf32> to vector<1x128xf32>
    %4 = vector.broadcast %2 : vector<32x1xf32> to vector<32x128xf32>
    %5 = vector.broadcast %3 : vector<1x128xf32> to vector<32x128xf32>
    %6 = arith.mulf %4, %5 : vector<32x128xf32>
    %7 = vector.extract_strided_slice %1 {offsets = [0, 1], sizes = [32, 1], strides = [1, 1]} : vector<32x3xf32> to vector<32x1xf32>
    %8 = vector.extract_strided_slice %0 {offsets = [1, 0], sizes = [1, 128], strides = [1, 1]} : vector<3x128xf32> to vector<1x128xf32>
    %9 = vector.broadcast %7 : vector<32x1xf32> to vector<32x128xf32>
    %10 = vector.broadcast %8 : vector<1x128xf32> to vector<32x128xf32>
    %11 = arith.mulf %9, %10 : vector<32x128xf32>
    %12 = arith.addf %6, %11 : vector<32x128xf32>
    %13 = vector.extract_strided_slice %1 {offsets = [0, 2], sizes = [32, 1], strides = [1, 1]} : vector<32x3xf32> to vector<32x1xf32>
    %14 = vector.extract_strided_slice %0 {offsets = [2, 0], sizes = [1, 128], strides = [1, 1]} : vector<3x128xf32> to vector<1x128xf32>
    %15 = vector.broadcast %13 : vector<32x1xf32> to vector<32x128xf32>
    %16 = vector.broadcast %14 : vector<1x128xf32> to vector<32x128xf32>
    %17 = arith.mulf %15, %16 : vector<32x128xf32>
    %18 = arith.addf %12, %17 : vector<32x128xf32>
    %c0_3 = arith.constant 0 : index
    %c0_4 = arith.constant 0 : index
    %19 = vector.load %arg5[%c0_3, %c0_4] : memref<32x1xf32, #tpu.memory_space<vmem>>, vector<32x1xf32>
    %20 = vector.broadcast %19 : vector<32x1xf32> to vector<32x128xf32>
    %21 = arith.addf %18, %20 : vector<32x128xf32>
    %c0_5 = arith.constant 0 : index
    %c0_6 = arith.constant 0 : index
    %22 = vector.load %arg8[%c0_5, %c0_6] : memref<32x1xf32, #tpu.memory_space<vmem>>, vector<32x1xf32>
    %23 = vector.broadcast %22 : vector<32x1xf32> to vector<32x128xf32>
    %24 = arith.mulf %21, %23 : vector<32x128xf32>
    %c0_7 = arith.constant 0 : index
    %c0_8 = arith.constant 0 : index
    %25 = vector.load %arg10[%c0_7, %c0_8] : memref<32x1xf32, #tpu.memory_space<vmem>>, vector<32x1xf32>
    %26 = vector.broadcast %25 : vector<32x1xf32> to vector<32x128xf32>
    %27 = arith.addf %24, %26 : vector<32x128xf32>
    %cst = arith.constant 0.000000e+00 : f32
    %28 = vector.broadcast %cst : f32 to vector<32x128xf32>
    %29 = arith.maximumf %27, %28 : vector<32x128xf32>
    %c0_9 = arith.constant 0 : index
    %c0_10 = arith.constant 0 : index
    %30 = vector.load %arg3[%c0_9, %c0_10] : memref<64x32xf32, #tpu.memory_space<vmem>>, vector<64x32xf32>
    %cst_11 = arith.constant dense<0.000000e+00> : vector<64x128xf32>
    %31 = tpu.matmul %30, %29, %cst_11 {dimension_numbers = #tpu.dot_dimension_numbers<[1], [0], [0], [1], [0, 0, 1, 1], [], []>} : vector<64x32xf32>, vector<32x128xf32>, vector<64x128xf32> -> vector<64x128xf32>
    %c0_12 = arith.constant 0 : index
    %c0_13 = arith.constant 0 : index
    %32 = vector.load %arg6[%c0_12, %c0_13] : memref<64x1xf32, #tpu.memory_space<vmem>>, vector<64x1xf32>
    %33 = vector.broadcast %32 : vector<64x1xf32> to vector<64x128xf32>
    %34 = arith.addf %31, %33 : vector<64x128xf32>
    %c0_14 = arith.constant 0 : index
    %c0_15 = arith.constant 0 : index
    %35 = vector.load %arg9[%c0_14, %c0_15] : memref<64x1xf32, #tpu.memory_space<vmem>>, vector<64x1xf32>
    %36 = vector.broadcast %35 : vector<64x1xf32> to vector<64x128xf32>
    %37 = arith.mulf %34, %36 : vector<64x128xf32>
    %c0_16 = arith.constant 0 : index
    %c0_17 = arith.constant 0 : index
    %38 = vector.load %arg11[%c0_16, %c0_17] : memref<64x1xf32, #tpu.memory_space<vmem>>, vector<64x1xf32>
    %39 = vector.broadcast %38 : vector<64x1xf32> to vector<64x128xf32>
    %40 = arith.addf %37, %39 : vector<64x128xf32>
    %cst_18 = arith.constant 0.000000e+00 : f32
    %41 = vector.broadcast %cst_18 : f32 to vector<64x128xf32>
    %42 = arith.maximumf %40, %41 : vector<64x128xf32>
    %c0_19 = arith.constant 0 : index
    %c0_20 = arith.constant 0 : index
    %43 = vector.load %arg4[%c0_19, %c0_20] : memref<32x64xf32, #tpu.memory_space<vmem>>, vector<32x64xf32>
    %cst_21 = arith.constant dense<0.000000e+00> : vector<32x128xf32>
    %44 = tpu.matmul %43, %42, %cst_21 {dimension_numbers = #tpu.dot_dimension_numbers<[1], [0], [0], [1], [0, 0, 1, 1], [], []>} : vector<32x64xf32>, vector<64x128xf32>, vector<32x128xf32> -> vector<32x128xf32>
    %c0_22 = arith.constant 0 : index
    %c0_23 = arith.constant 0 : index
    %45 = vector.load %arg7[%c0_22, %c0_23] : memref<32x1xf32, #tpu.memory_space<vmem>>, vector<32x1xf32>
    %46 = vector.broadcast %45 : vector<32x1xf32> to vector<32x128xf32>
    %47 = arith.addf %44, %46 : vector<32x128xf32>
    %c0_24 = arith.constant 0 : index
    %c0_25 = arith.constant 0 : index
    %48 = vector.load %arg12[%c0_24, %c0_25] : memref<32x128xf32, #tpu.memory_space<vmem>>, vector<32x128xf32>
    tpu.vector_store %arg12[%c0_24, %c0_25], %47 {strides = array<i32>} : memref<32x128xf32, #tpu.memory_space<vmem>>, vector<32x128xf32>,
    return
  }
  func.func @transform_0(%arg0: i32) -> (i32, i32) {
    %c0_i32 = arith.constant 0 : i32
    %c0_i32_0 = arith.constant 0 : i32
    return %c0_i32, %arg0 : i32, i32
  }
  func.func @transform_1(%arg0: i32) -> (i32, i32) {
    %c0_i32 = arith.constant 0 : i32
    %c0_i32_0 = arith.constant 0 : i32
    %c0_i32_1 = arith.constant 0 : i32
    return %c0_i32, %c0_i32_0 : i32, i32
  }
  func.func @transform_2(%arg0: i32) -> (i32, i32) {
    %c0_i32 = arith.constant 0 : i32
    %c0_i32_0 = arith.constant 0 : i32
    %c0_i32_1 = arith.constant 0 : i32
    return %c0_i32, %c0_i32_0 : i32, i32
  }
  func.func @transform_3(%arg0: i32) -> (i32, i32) {
    %c0_i32 = arith.constant 0 : i32
    %c0_i32_0 = arith.constant 0 : i32
    %c0_i32_1 = arith.constant 0 : i32
    return %c0_i32, %c0_i32_0 : i32, i32
  }
  func.func @transform_4(%arg0: i32) -> (i32, i32) {
    %c0_i32 = arith.constant 0 : i32
    %c0_i32_0 = arith.constant 0 : i32
    %c0_i32_1 = arith.constant 0 : i32
    return %c0_i32, %c0_i32_0 : i32, i32
  }
  func.func @transform_5(%arg0: i32) -> (i32, i32) {
    %c0_i32 = arith.constant 0 : i32
    %c0_i32_0 = arith.constant 0 : i32
    %c0_i32_1 = arith.constant 0 : i32
    return %c0_i32, %c0_i32_0 : i32, i32
  }
  func.func @transform_6(%arg0: i32) -> (i32, i32) {
    %c0_i32 = arith.constant 0 : i32
    %c0_i32_0 = arith.constant 0 : i32
    %c0_i32_1 = arith.constant 0 : i32
    return %c0_i32, %c0_i32_0 : i32, i32
  }
  func.func @transform_7(%arg0: i32) -> (i32, i32) {
    %c0_i32 = arith.constant 0 : i32
    %c0_i32_0 = arith.constant 0 : i32
    %c0_i32_1 = arith.constant 0 : i32
    return %c0_i32, %c0_i32_0 : i32, i32
  }
  func.func @transform_8(%arg0: i32) -> (i32, i32) {
    %c0_i32 = arith.constant 0 : i32
    %c0_i32_0 = arith.constant 0 : i32
    %c0_i32_1 = arith.constant 0 : i32
    return %c0_i32, %c0_i32_0 : i32, i32
  }
  func.func @transform_9(%arg0: i32) -> (i32, i32) {
    %c0_i32 = arith.constant 0 : i32
    %c0_i32_0 = arith.constant 0 : i32
    %c0_i32_1 = arith.constant 0 : i32
    return %c0_i32, %c0_i32_0 : i32, i32
  }
  func.func @transform_10(%arg0: i32) -> (i32, i32) {
    %c0_i32 = arith.constant 0 : i32
    %c0_i32_0 = arith.constant 0 : i32
    %c0_i32_1 = arith.constant 0 : i32
    return %c0_i32, %c0_i32_0 : i32, i32
  }
  func.func @transform_11(%arg0: i32) -> (i32, i32) {
    %c0_i32 = arith.constant 0 : i32
    %c0_i32_0 = arith.constant 0 : i32
    return %c0_i32, %arg0 : i32, i32
  }
}

</mosaic_0001>

<bundles_post_ra>
// kernel: squeeze.3
= control target key start
LH: loop header
LB: loop body
LE: loop exit
PB: predicated region body
PF: predicated region fallthrough
CT: control target
= control target key end

     0   :  { %vm12_vm0 = vcmask 130048   ;;  %s73_s10 = smov 80   ;;  %s74_s11 = smov 96   ;;  %vm18_vm1 = vcmask 1048448   ;;  %vm24_vm2 = vcmask 917248   ;;  %vm30_vm3 = vcmask 786048   ;;  %s98_s0 = inlined_call_operand.vmem [shape: f32[2,4,16], index: 0, kind: input, shape index: {}]   ;;  %s99_s1 = inlined_call_operand.vmem [shape: f32[1,128], index: 1, kind: output, shape index: {}]  }
   0x1   :  { %v64_v0 = vld [vmem:[%s98_s0 + $0x4] sm:$0xf]  ;;  %v9_v1 = vld [vmem:[%s98_s0] sm:$0xf]  ;;  %s72_s0 = smov 112   ;;  %s75_s12 = smov 64  }
   0x2   :  { %8 = vst [vmem:[#allocation1 + $0x8] sm:$0xf] %v64_v0  ;;  %10 = vst [vmem:[#allocation1] sm:$0xf] %v9_v1  ;;  %s76_s13 = smov 48   ;;  %s77_s14 = smov 32  }
   0x3   :  { %s78_s15 = smov 16   ;;  %vm36_vm4 = vcmask 654848   ;;  %vm42_vm5 = vcmask 523648   ;;  %vm48_vm6 = vcmask 392448   ;;  %vm54_vm7 = vcmask 261248  }
   0x9   :  { %v15_v2 = vld [vmem:[#allocation1 + $0xb] sm:$0x1]   ;;  %v27_v3 = vld [vmem:[#allocation1 + $0x9] sm:$0x1]   ;;  %v21_v4 = vld [vmem:[#allocation1 + $0xa] sm:$0x1]  }
   0xa   :  { %16 = vrot.lane.b32.xlu0 %v15_v2, %s72_s0  ;;  %28 = vrot.lane.b32.xlu1 %v27_v3, %s73_s10  ;;  %v33_v5 = vld [vmem:[#allocation1 + $0x8] sm:$0x1]   ;;  %v11_v6 = vld [vmem:[#allocation1] sm:$0x1]   ;;  %v39_v7 = vld [vmem:[#allocation1 + $0x3] sm:$0x1]  }
   0xb   :  { %13 = vst.msk [vmem:[#allocation0] sm:$0x1] %vm12_vm0, %v11_v6   ;;  %v45_v8 = vld [vmem:[#allocation1 + $0x2] sm:$0x1]   ;;  %v51_v9 = vld [vmem:[#allocation1 + $0x1] sm:$0x1]  }
   0xe   :  { %22 = vrot.lane.b32.xlu0 %v21_v4, %s74_s11  ;;  %34 = vrot.lane.b32.xlu1 %v33_v5, %s75_s12 }
  0x12   :  { %40 = vrot.lane.b32.xlu0 %v39_v7, %s76_s13  ;;  %46 = vrot.lane.b32.xlu1 %v45_v8, %s77_s14 }
  0x16   :  { %52 = vrot.lane.b32.xlu0 %v51_v9, %s78_s15 }
  0x7c   :  { %v17_v10 = vpop.permute.xlu0 %16   ;;  %v29_v11 = vpop.permute.xlu1 %28  }
  0x7d   :  { %19 = vst.msk [vmem:[#allocation0] sm:$0x1] %vm18_vm1, %v17_v10  }
  0x80   :  { %v23_v12 = vpop.permute.xlu0 %22   ;;  %v35_v13 = vpop.permute.xlu1 %34  }
  0x81   :  { %25 = vst.msk [vmem:[#allocation0] sm:$0x1] %vm24_vm2, %v23_v12  }
  0x82   :  { %31 = vst.msk [vmem:[#allocation0] sm:$0x1] %vm30_vm3, %v29_v11  }
  0x83   :  { %37 = vst.msk [vmem:[#allocation0] sm:$0x1] %vm36_vm4, %v35_v13  }
  0x84   :  { %v41_v14 = vpop.permute.xlu0 %40   ;;  %v47_v15 = vpop.permute.xlu1 %46  }
  0x85   :  { %43 = vst.msk [vmem:[#allocation0] sm:$0x1] %vm42_vm5, %v41_v14  }
  0x86   :  { %49 = vst.msk [vmem:[#allocation0] sm:$0x1] %vm48_vm6, %v47_v15  }
  0x88   :  { %v53_v16 = vpop.permute.xlu0 %52  }
  0x89   :  { %55 = vst.msk [vmem:[#allocation0] sm:$0x1] %vm54_vm7, %v53_v16  }
  0x90   :  { %v60_v17 = vld [vmem:[#allocation0] sm:$0x1] }
  0x91   :  { %63 = vst [vmem:[%s99_s1] sm:$0x1] %v60_v17 }

// kernel: word_positional_encoder.4
= control target key start
LH: loop header
LB: loop body
LE: loop exit
PB: predicated region body
PF: predicated region fallthrough
CT: control target
= control target key end

     0   :  { %v573_v0 = vmov 1   ;;  %v574_v1 = vmov 0   ;;  %v575_v5 = vmov 2   ;;  %vm261_vm0 = vcmask 261120   ;;  %s905_s1 = inlined_call_operand.vmem [shape: f32[32,3], index: 1, kind: input, shape index: {}]   ;;  %s906_s3 = inlined_call_operand.vmem [shape: f32[32,1], index: 3, kind: input, shape index: {}]   ;;  %s907_s5 = inlined_call_operand.vmem [shape: f32[32,1], index: 5, kind: input, shape index: {}]   ;;  %s908_s6 = inlined_call_operand.vmem [shape: f32[32,1], index: 6, kind: input, shape index: {}]   ;;  %s909_s4 = inlined_call_operand.vmem [shape: f32[64,1], index: 4, kind: input, shape index: {}]   ;;  %s910_s2 = inlined_call_operand.vmem [shape: f32[64,32], index: 2, kind: input, shape index: {}]   ;;  %s911_s0 = inlined_call_operand.vmem [shape: f32[3,128], index: 0, kind: input, shape index: {}]   ;;  %s912_s7 = inlined_call_operand.vmem [shape: f32[64,1], index: 7, kind: output, shape index: {0}]   ;;  %s913_s8 = inlined_call_operand.vmem [shape: f32[64,1], index: 8, kind: output, shape index: {1}]  }
   0x1   :  { %561 = vset.pattern.permute.xlu0 %v573_v0  ;;  %562 = vset.pattern.permute.xlu1 %v574_v1  ;;  %v32_v2 = vld [vmem:[%s905_s1 + $0x18] sm:$0xff]  ;;  %v31_v3 = vld [vmem:[%s905_s1 + $0x10] sm:$0xff]  ;;  %v30_v4 = vld [vmem:[%s905_s1 + $0x8] sm:$0xff]  ;;  %v53_v37 = vlaneseq  ;;  %vm395_vm1 = vcmask 7168  }
   0x2   :  { %74 = vperm.xlu0 %561, %v32_v2   ;;  %45 = vperm.xlu1 %562, %v31_v3   ;;  %v29_v6 = vld [vmem:[%s905_s1] sm:$0xff]  ;;  %v119_v7 = vld [vmem:[%s906_s3 + $0x10] sm:$0xff]  ;;  %v120_v10 = vld [vmem:[%s906_s3 + $0x18] sm:$0xff] }
   0x3   :  { %v147_v8 = vld [vmem:[%s907_s5 + $0x10] sm:$0xff]  ;;  %v117_v9 = vld [vmem:[%s906_s3] sm:$0xff]  ;;  %v174_v12 = vld [vmem:[%s908_s6 + $0x8] sm:$0xff]  ;;  %v54_v40 = vshrl.u32 %v53_v37, 7 }
   0x4   :  { %v175_v11 = vld [vmem:[%s908_s6 + $0x10] sm:$0xff]  ;;  %v148_v13 = vld [vmem:[%s907_s5 + $0x18] sm:$0xff]  ;;  %v213_v14 = vld [vmem:[%s909_s4] sm:$0xff] }
   0x5   :  { %v118_v15 = vld [vmem:[%s906_s3 + $0x8] sm:$0xff]  ;;  %v215_v16 = vld [vmem:[%s909_s4 + $0x10] sm:$0xff]  ;;  %v176_v17 = vld [vmem:[%s908_s6 + $0x18] sm:$0xff]  ;;  %v79_v41 = vsub.s32 1, %v54_v40  ;;  %v55_v43 = vsub.s32 0, %v54_v40  ;;  %v107_v47 = vsub.s32 2, %v54_v40 }
   0x6   :  { %568 = vset.pattern.permute.xlu0 %v575_v5  ;;  %563 = vset.pattern.permute.xlu1 %v573_v0  ;;  %v217_v18 = vld [vmem:[%s909_s4 + $0x20] sm:$0xff]  ;;  %v146_v19 = vld [vmem:[%s907_s5 + $0x8] sm:$0xff]  ;;  %v219_v20 = vld [vmem:[%s909_s4 + $0x30] sm:$0xff]  ;;  %v576_v40 = vmov 0.0  }
   0x7   :  { %70 = vperm.xlu1 %563, %v31_v3   ;;  %94 = vperm.xlu0 %568, %v30_v4   ;;  %v145_v21 = vld [vmem:[%s907_s5] sm:$0xff]  ;;  %v214_v25 = vld [vmem:[%s909_s4 + $0x8] sm:$0xff]  ;;  %v216_v26 = vld [vmem:[%s909_s4 + $0x18] sm:$0xff]  ;;  %401 = vst.msk [vmem:[%s912_s7 + $0x28] sm:$0xff] %vm395_vm1, %v576_v40 }
   0x8   :  { %v173_v22 = vld [vmem:[%s908_s6] sm:$0xff]  ;;  %v218_v27 = vld [vmem:[%s909_s4 + $0x28] sm:$0xff]  ;;  %v220_v28 = vld [vmem:[%s909_s4 + $0x38] sm:$0xff]  ;;  %396 = vst.msk [vmem:[%s912_s7] sm:$0xff] %vm395_vm1, %v576_v40 }
   0x9   :  { %v205_v23 = vld [vmem:[%s910_s2] sm:$0xff]  ;;  %v211_v37 = vld [vmem:[%s910_s2 + $0x30] sm:$0xff]  ;;  %397 = vst.msk [vmem:[%s912_s7 + $0x8] sm:$0xff] %vm395_vm1, %v576_v40  ;;  %398 = vst.msk [vmem:[%s912_s7 + $0x10] sm:$0xff] %vm395_vm1, %v576_v40 }
   0xa   :  { %v209_v24 = vld [vmem:[%s910_s2 + $0x20] sm:$0xff]  ;;  %537 = vmatprep.mubr.msk.f32.mxu0 %vm261_vm0, %v205_v23  ;;  %399 = vst.msk [vmem:[%s912_s7 + $0x18] sm:$0xff] %vm395_vm1, %v576_v40  ;;  %400 = vst.msk [vmem:[%s912_s7 + $0x20] sm:$0xff] %vm395_vm1, %v576_v40 }
   0xb   :  { %564 = vset.pattern.permute.xlu1 %v575_v5  ;;  %569 = vset.pattern.permute.xlu0 %v574_v1  ;;  %v28_v44 = vld [vmem:[%s911_s0] sm:$0x7]  ;;  %402 = vst.msk [vmem:[%s912_s7 + $0x30] sm:$0xff] %vm395_vm1, %v576_v40  ;;  %403 = vst.msk [vmem:[%s912_s7 + $0x38] sm:$0xff] %vm395_vm1, %v576_v40 }
   0xc   :  { %102 = vperm.xlu1 %564, %v32_v2   ;;  %50 = vperm.xlu0 %569, %v32_v2   ;;  %v80_v46 = vrot.slane %v28_v44, %v79_v41  ;;  %v56_v49 = vrot.slane %v28_v44, %v55_v43  ;;  %v108_v51 = vrot.slane %v28_v44, %v107_v47 }
   0xd   :  { %543 = vmatprep.mubr.msk.f32.mxu1 %vm261_vm0, %v209_v24  ;;  %405 = vst.msk [vmem:[%s913_s8 + $0x8] sm:$0xff] %vm395_vm1, %v576_v40  ;;  %404 = vst.msk [vmem:[%s913_s8] sm:$0xff] %vm395_vm1, %v576_v40 }
   0xe   :  { %406 = vst.msk [vmem:[%s913_s8 + $0x10] sm:$0xff] %vm395_vm1, %v576_v40  ;;  %407 = vst.msk [vmem:[%s913_s8 + $0x18] sm:$0xff] %vm395_vm1, %v576_v40 }
   0xf   :  { %408 = vst.msk [vmem:[%s913_s8 + $0x20] sm:$0xff] %vm395_vm1, %v576_v40  ;;  %409 = vst.msk [vmem:[%s913_s8 + $0x28] sm:$0xff] %vm395_vm1, %v576_v40 }
  0x10   :  { %565 = vset.pattern.permute.xlu1 %v573_v0  ;;  %40 = vperm.xlu0 %569, %v30_v4   ;;  %410 = vst.msk [vmem:[%s913_s8 + $0x30] sm:$0xff] %vm395_vm1, %v576_v40  ;;  %411 = vst.msk [vmem:[%s913_s8 + $0x38] sm:$0xff] %vm395_vm1, %v576_v40 }
  0x11   :  { %66 = vperm.xlu1 %565, %v30_v4  }
  0x14   :  { %35 = vperm.xlu0 %569, %v29_v6  }
  0x15   :  { %566 = vset.pattern.permute.xlu1 %v575_v5  ;;  %v455_v40 = vld [vmem:[%s913_s8 + $0x10] sm:$0xff] }
  0x16   :  { %98 = vperm.xlu1 %566, %v31_v3  }
  0x18   :  { %133 = vperm.xlu0 %569, %v119_v7  }
  0x1a   :  { %567 = vset.pattern.permute.xlu1 %v573_v0 }
  0x1b   :  { %62 = vperm.xlu1 %567, %v29_v6  }
  0x1c   :  { %161 = vperm.xlu0 %569, %v147_v8  }
  0x1f   :  { %570 = vset.pattern.permute.xlu1 %v574_v1 }
  0x20   :  { %123 = vperm.xlu0 %569, %v117_v9   ;;  %138 = vperm.xlu1 %570, %v120_v10  }
  0x24   :  { %189 = vperm.xlu0 %569, %v175_v11   ;;  %571 = vset.pattern.permute.xlu1 %v575_v5 }
  0x25   :  { %90 = vperm.xlu1 %571, %v29_v6  }
  0x28   :  { %184 = vperm.xlu0 %569, %v174_v12  }
  0x29   :  { %572 = vset.pattern.permute.xlu1 %v574_v1 }
  0x2a   :  { %166 = vperm.xlu1 %572, %v148_v13  }
  0x2c   :  { %223 = vperm.xlu0 %569, %v213_v14  }
  0x2e   :  { %128 = vperm.xlu1 %572, %v118_v15  }
  0x30   :  { %233 = vperm.xlu0 %569, %v215_v16  }
  0x32   :  { %194 = vperm.xlu1 %572, %v176_v17  }
  0x34   :  { %243 = vperm.xlu0 %569, %v217_v18  }
  0x36   :  { %156 = vperm.xlu1 %572, %v146_v19  }
  0x38   :  { %253 = vperm.xlu0 %569, %v219_v20  }
  0x3a   :  { %151 = vperm.xlu1 %572, %v145_v21  }
  0x3e   :  { %179 = vperm.xlu1 %572, %v173_v22  }
  0x42   :  { %228 = vperm.xlu1 %572, %v214_v25  }
  0x46   :  { %238 = vperm.xlu1 %572, %v216_v26  }
  0x4a   :  { %248 = vperm.xlu1 %572, %v218_v27  }
  0x4e   :  { %258 = vperm.xlu1 %572, %v220_v28  }
  0x7d   :  { %v46_v29 = vpop.permute.xlu1 %45  ;;  %v75_v30 = vpop.permute.xlu0 %74 }
  0x7e   :  { %v59_v53 = vmul.f32 %v56_v49, %v46_v29  ;;  %v84_v54 = vmul.f32 %v80_v46, %v75_v30 }
  0x82   :  { %v71_v31 = vpop.permute.xlu1 %70  ;;  %v95_v32 = vpop.permute.xlu0 %94 }
  0x83   :  { %v83_v50 = vmul.f32 %v80_v46, %v71_v31  ;;  %v110_v5 = vmul.f32 %v108_v51, %v95_v32 }
  0x85   :  { %v87_v58 = vadd.f32 %v83_v50, %v59_v53 }
  0x87   :  { %v103_v33 = vpop.permute.xlu1 %102  ;;  %v51_v34 = vpop.permute.xlu0 %50 }
  0x88   :  { %v60_v55 = vmul.f32 %v56_v49, %v51_v34  ;;  %v112_v63 = vmul.f32 %v108_v51, %v103_v33  ;;  %v206_v34 = vld [vmem:[%s910_s2 + $0x8] sm:$0xff] }
  0x8a   :  { %v88_v59 = vadd.f32 %v84_v54, %v60_v55 }
  0x8b   :  { %v41_v36 = vpop.permute.xlu0 %40 }
  0x8c   :  { %v67_v35 = vpop.permute.xlu1 %66  ;;  %v58_v0 = vmul.f32 %v56_v49, %v41_v36  ;;  %v116_v3 = vadd.f32 %v112_v63, %v88_v59  ;;  %v207_v36 = vld [vmem:[%s910_s2 + $0x10] sm:$0xff] }
  0x8d   :  { %v82_v1 = vmul.f32 %v80_v46, %v67_v35  ;;  %v210_v35 = vld [vmem:[%s910_s2 + $0x28] sm:$0xff] }
  0x8f   :  { %v36_v39 = vpop.permute.xlu0 %35  ;;  %v86_v6 = vadd.f32 %v82_v1, %v58_v0 }
  0x90   :  { %v57_v9 = vmul.f32 %v56_v49, %v36_v39  ;;  %v212_v39 = vld [vmem:[%s910_s2 + $0x38] sm:$0xff] }
  0x91   :  { %v99_v38 = vpop.permute.xlu1 %98  ;;  %v114_v16 = vadd.f32 %v110_v5, %v86_v6 }
  0x92   :  { %v111_v56 = vmul.f32 %v108_v51, %v99_v38  ;;  %v208_v38 = vld [vmem:[%s910_s2 + $0x18] sm:$0xff] }
  0x93   :  { %v134_v45 = vpop.permute.xlu0 %133 }
  0x94   :  { %v115_v60 = vadd.f32 %v111_v56, %v87_v58 }
  0x96   :  { %v63_v42 = vpop.permute.xlu1 %62  ;;  %v143_v2 = vadd.f32 %v134_v45, %v115_v60 }
  0x97   :  { %v162_v52 = vpop.permute.xlu0 %161  ;;  %v81_v10 = vmul.f32 %v80_v46, %v63_v42 }
  0x98   :  { %v171_v11 = vmul.f32 %v162_v52, %v143_v2 }
  0x99   :  { %v85_v18 = vadd.f32 %v81_v10, %v57_v9  ;;  %v417_v9 = vld [vmem:[%s912_s7 + $0x28] sm:$0xff] }
  0x9a   :  { %v413_v10 = vld [vmem:[%s912_s7 + $0x8] sm:$0xff] }
  0x9b   :  { %v139_v48 = vpop.permute.xlu1 %138  ;;  %v124_v61 = vpop.permute.xlu0 %123 }
  0x9c   :  { %v144_v7 = vadd.f32 %v139_v48, %v116_v3 }
  0x9f   :  { %v190_v8 = vpop.permute.xlu0 %189 }
  0xa0   :  { %v91_v57 = vpop.permute.xlu1 %90  ;;  %v199_v14 = vadd.f32 %v190_v8, %v171_v11 }
  0xa1   :  { %v109_v15 = vmul.f32 %v108_v51, %v91_v57 }
  0xa2   :  { %v203_v22 = vmax.f32 %v199_v14, 0.0 }
  0xa3   :  { %v113_v23 = vadd.f32 %v109_v15, %v85_v18  ;;  %v185_v25 = vpop.permute.xlu0 %184  ;;  %v416_v15 = vld [vmem:[%s912_s7 + $0x20] sm:$0xff] }
  0xa5   :  { %v167_v62 = vpop.permute.xlu1 %166  ;;  %v141_v29 = vadd.f32 %v124_v61, %v113_v23 }
  0xa6   :  { %v172_v12 = vmul.f32 %v167_v62, %v144_v7 }
  0xa7   :  { %v224_v42 = vpop.permute.xlu0 %223 }
  0xa9   :  { %v129_v4 = vpop.permute.xlu1 %128 }
  0xaa   :  { %v142_v19 = vadd.f32 %v129_v4, %v114_v16  ;;  %v412_v16 = vld [vmem:[%s912_s7] sm:$0xff] }
  0xab   :  { %v234_v44 = vpop.permute.xlu0 %233 }
  0xad   :  { %v195_v13 = vpop.permute.xlu1 %194 }
  0xae   :  { %v200_v17 = vadd.f32 %v195_v13, %v172_v12 }
  0xaf   :  { %v244_v52 = vpop.permute.xlu0 %243 }
  0xb0   :  { %v204_v20 = vmax.f32 %v200_v17, 0.0 }
  0xb1   :  { %v157_v21 = vpop.permute.xlu1 %156 }
  0xb2   :  { %v170_v24 = vmul.f32 %v157_v21, %v142_v19  ;;  %529 = vmatprep.subr.mxu0 %v204_v20  ;;  %549 = vmatprep.subr.mxu1 %v204_v20  ;;  %v454_v21 = vld [vmem:[%s913_s8 + $0x8] sm:$0xff] }
  0xb3   :  { %530 = vmatpush3.msra.mxu0 %v204_v20  ;;  %553 = vmatpush3.msra.mxu1 %v204_v20  ;;  %v254_v63 = vpop.permute.xlu0 %253 }
  0xb4   :  { %v198_v26 = vadd.f32 %v185_v25, %v170_v24  ;;  %531 = vmatprep.subr.mxu0 %v203_v22  ;;  %550 = vmatprep.subr.mxu1 %v203_v22 }
  0xb5   :  { %v152_v27 = vpop.permute.xlu1 %151  ;;  %532 = vmatpush3.msra.mxu0 %v203_v22  ;;  %554 = vmatpush3.msra.mxu1 %v203_v22  ;;  %v453_v22 = vld [vmem:[%s913_s8] sm:$0xff] }
  0xb6   :  { %v202_v28 = vmax.f32 %v198_v26, 0.0  ;;  %v169_v30 = vmul.f32 %v152_v27, %v141_v29  ;;  %v458_v27 = vld [vmem:[%s913_s8 + $0x28] sm:$0xff] }
  0xb8   :  { %533 = vmatprep.subr.mxu0 %v202_v28  ;;  %551 = vmatprep.subr.mxu1 %v202_v28 }
  0xb9   :  { %v180_v31 = vpop.permute.xlu1 %179  ;;  %534 = vmatpush3.msra.mxu0 %v202_v28  ;;  %555 = vmatpush3.msra.mxu1 %v202_v28  ;;  %v457_v28 = vld [vmem:[%s913_s8 + $0x20] sm:$0xff] }
  0xba   :  { %v197_v32 = vadd.f32 %v180_v31, %v169_v30 }
  0xbc   :  { %v201_v33 = vmax.f32 %v197_v32, 0.0 }
  0xbd   :  { %v229_v41 = vpop.permute.xlu1 %228 }
  0xbe   :  { %535 = vmatprep.subr.mxu0 %v201_v33  ;;  %552 = vmatprep.subr.mxu1 %v201_v33 }
  0xbf   :  { %536 = vmatpush3.msra.mxu0 %v201_v33  ;;  %556 = vmatpush3.msra.mxu1 %v201_v33  ;;  %v415_v33 = vld [vmem:[%s912_s7 + $0x18] sm:$0xff] }
  0xc0   :  { %538 = vmatmul.mubr.msk.f32.vlgmr.msra.gmra.mxu0 %vm261_vm0, %v206_v34  ;;  %544 = vmatmul.mubr.msk.f32.vlgmr.msra.gmra.mxu1 %vm261_vm0, %v210_v35  ;;  %v418_v34 = vld [vmem:[%s912_s7 + $0x30] sm:$0xff] }
  0xc1   :  { %540 = vmatprep.mubr.msk.f32.mxu0 %vm261_vm0, %v207_v36  ;;  %546 = vmatprep.mubr.msk.f32.mxu1 %vm261_vm0, %v211_v37  ;;  %v239_v43 = vpop.permute.xlu1 %238 }
  0xc4   :  { %541 = vmatmul.mubr.msk.f32.gmra.mxu0 %vm261_vm0, %v208_v38  ;;  %547 = vmatmul.mubr.msk.f32.gmra.mxu1 %vm261_vm0, %v212_v39  ;;  %v419_v39 = vld [vmem:[%s912_s7 + $0x38] sm:$0xff] }
  0xc5   :  { %v249_v45 = vpop.permute.xlu1 %248 }
  0xc9   :  { %v259_v3 = vpop.permute.xlu1 %258 }
 0x180   :  { %v539_v46 = vpop.f32.mrf.mxu0  ;;  %v545_v47 = vpop.f32.mrf.mxu1 }
 0x181   :  { %v358_v48 = vadd.f32 %v539_v46, %v229_v41  ;;  %v378_v49 = vadd.f32 %v545_v47, %v249_v45  ;;  %v414_v45 = vld [vmem:[%s912_s7 + $0x10] sm:$0xff] }
 0x182   :  { %v352_v50 = vpop.f32.mrf.mxu0  ;;  %v372_v51 = vpop.f32.mrf.mxu1  ;;  %v459_v46 = vld [vmem:[%s913_s8 + $0x30] sm:$0xff] }
 0x183   :  { %430 = vadd.xlane.f32.xlu0 %v378_v49  ;;  %422 = vadd.xlane.f32.xlu1 %v358_v48  ;;  %v353_v53 = vadd.f32 %v352_v50, %v224_v42  ;;  %v373_v54 = vadd.f32 %v372_v51, %v244_v52  ;;  %v462_v55 = vmul.f32 %v358_v48, %v358_v48  ;;  %v456_v51 = vld [vmem:[%s913_s8 + $0x18] sm:$0xff] }
 0x184   :  { %v542_v57 = vpop.f32.mrf.mxu0  ;;  %v548_v58 = vpop.f32.mrf.mxu1  ;;  %v466_v59 = vmul.f32 %v378_v49, %v378_v49 }
 0x185   :  { %v461_v56 = vmul.f32 %v353_v53, %v353_v53  ;;  %v465_v60 = vmul.f32 %v373_v54, %v373_v54  ;;  %v368_v0 = vadd.f32 %v542_v57, %v239_v43  ;;  %v388_v4 = vadd.f32 %v548_v58, %v259_v3 }
 0x186   :  { %v362_v61 = vpop.f32.mrf.mxu0  ;;  %v382_v62 = vpop.f32.mrf.mxu1 }
 0x187   :  { %428 = vadd.xlane.f32.xlu1 %v373_v54  ;;  %420 = vadd.xlane.f32.xlu0 %v353_v53  ;;  %v363_v1 = vadd.f32 %v362_v61, %v234_v44  ;;  %v383_v2 = vadd.f32 %v382_v62, %v254_v63  ;;  %v464_v7 = vmul.f32 %v368_v0, %v368_v0  ;;  %v460_v54 = vld [vmem:[%s913_s8 + $0x38] sm:$0xff] }
 0x188   :  { %v468_v8 = vmul.f32 %v388_v4, %v388_v4 }
 0x189   :  { %v463_v5 = vmul.f32 %v363_v1, %v363_v1  ;;  %v467_v6 = vmul.f32 %v383_v2, %v383_v2 }
 0x18b   :  { %471 = vadd.xlane.f32.xlu0 %v462_v55  ;;  %469 = vadd.xlane.f32.xlu1 %v461_v56 }
 0x18f   :  { %479 = vadd.xlane.f32.xlu0 %v466_v59  ;;  %477 = vadd.xlane.f32.xlu1 %v465_v60 }
 0x193   :  { %426 = vadd.xlane.f32.xlu0 %v368_v0  ;;  %432 = vadd.xlane.f32.xlu1 %v383_v2 }
 0x197   :  { %434 = vadd.xlane.f32.xlu0 %v388_v4  ;;  %473 = vadd.xlane.f32.xlu1 %v463_v5 }
 0x19b   :  { %424 = vadd.xlane.f32.xlu0 %v363_v1  ;;  %481 = vadd.xlane.f32.xlu1 %v467_v6 }
 0x19f   :  { %475 = vadd.xlane.f32.xlu0 %v464_v7 }
 0x1a3   :  { %483 = vadd.xlane.f32.xlu0 %v468_v8 }
 0x20c   :  { %v431_v11 = vpop.xlane.xlu0 %430  ;;  %v423_v12 = vpop.xlane.xlu1 %422 }
 0x20d   :  { %v441_v13 = vadd.f32 %v431_v11, %v417_v9  ;;  %v437_v14 = vadd.f32 %v423_v12, %v413_v10 }
 0x20f   :  { %450 = vst.msk [vmem:[%s912_s7 + $0x28] sm:$0xff] %vm395_vm1, %v441_v13  ;;  %446 = vst.msk [vmem:[%s912_s7 + $0x8] sm:$0xff] %vm395_vm1, %v437_v14 }
 0x210   :  { %v429_v17 = vpop.xlane.xlu1 %428  ;;  %v421_v18 = vpop.xlane.xlu0 %420 }
 0x211   :  { %v440_v19 = vadd.f32 %v429_v17, %v416_v15  ;;  %v436_v20 = vadd.f32 %v421_v18, %v412_v16 }
 0x213   :  { %449 = vst.msk [vmem:[%s912_s7 + $0x20] sm:$0xff] %vm395_vm1, %v440_v19  ;;  %445 = vst.msk [vmem:[%s912_s7] sm:$0xff] %vm395_vm1, %v436_v20 }
 0x214   :  { %v472_v23 = vpop.xlane.xlu0 %471  ;;  %v470_v24 = vpop.xlane.xlu1 %469 }
 0x215   :  { %v486_v25 = vadd.f32 %v472_v23, %v454_v21  ;;  %v485_v26 = vadd.f32 %v470_v24, %v453_v22 }
 0x217   :  { %494 = vst.msk [vmem:[%s913_s8 + $0x8] sm:$0xff] %vm395_vm1, %v486_v25  ;;  %493 = vst.msk [vmem:[%s913_s8] sm:$0xff] %vm395_vm1, %v485_v26 }
 0x218   :  { %v480_v29 = vpop.xlane.xlu0 %479  ;;  %v478_v30 = vpop.xlane.xlu1 %477 }
 0x219   :  { %v490_v31 = vadd.f32 %v480_v29, %v458_v27  ;;  %v489_v32 = vadd.f32 %v478_v30, %v457_v28 }
 0x21b   :  { %498 = vst.msk [vmem:[%s913_s8 + $0x28] sm:$0xff] %vm395_vm1, %v490_v31  ;;  %497 = vst.msk [vmem:[%s913_s8 + $0x20] sm:$0xff] %vm395_vm1, %v489_v32 }
 0x21c   :  { %v427_v35 = vpop.xlane.xlu0 %426  ;;  %v433_v36 = vpop.xlane.xlu1 %432 }
 0x21d   :  { %v439_v37 = vadd.f32 %v427_v35, %v415_v33  ;;  %v442_v38 = vadd.f32 %v433_v36, %v418_v34 }
 0x21f   :  { %448 = vst.msk [vmem:[%s912_s7 + $0x18] sm:$0xff] %vm395_vm1, %v439_v37  ;;  %451 = vst.msk [vmem:[%s912_s7 + $0x30] sm:$0xff] %vm395_vm1, %v442_v38 }
 0x220   :  { %v435_v41 = vpop.xlane.xlu0 %434  ;;  %v474_v42 = vpop.xlane.xlu1 %473 }
 0x221   :  { %v443_v43 = vadd.f32 %v435_v41, %v419_v39  ;;  %v487_v44 = vadd.f32 %v474_v42, %v455_v40 }
 0x223   :  { %452 = vst.msk [vmem:[%s912_s7 + $0x38] sm:$0xff] %vm395_vm1, %v443_v43  ;;  %495 = vst.msk [vmem:[%s913_s8 + $0x10] sm:$0xff] %vm395_vm1, %v487_v44 }
 0x224   :  { %v425_v47 = vpop.xlane.xlu0 %424  ;;  %v482_v48 = vpop.xlane.xlu1 %481 }
 0x225   :  { %v438_v49 = vadd.f32 %v425_v47, %v414_v45  ;;  %v491_v50 = vadd.f32 %v482_v48, %v459_v46 }
 0x227   :  { %447 = vst.msk [vmem:[%s912_s7 + $0x10] sm:$0xff] %vm395_vm1, %v438_v49  ;;  %499 = vst.msk [vmem:[%s913_s8 + $0x30] sm:$0xff] %vm395_vm1, %v491_v50 }
 0x228   :  { %v476_v52 = vpop.xlane.xlu0 %475 }
 0x229   :  { %v488_v53 = vadd.f32 %v476_v52, %v456_v51 }
 0x22b   :  { %496 = vst.msk [vmem:[%s913_s8 + $0x18] sm:$0xff] %vm395_vm1, %v488_v53 }
 0x22c   :  { %v484_v55 = vpop.xlane.xlu0 %483 }
 0x22d   :  { %v492_v56 = vadd.f32 %v484_v55, %v460_v54 }
 0x22f   :  { %500 = vst.msk [vmem:[%s913_s8 + $0x38] sm:$0xff] %vm395_vm1, %v492_v56 }

// kernel: word_positional_encoder.3
= control target key start
LH: loop header
LB: loop body
LE: loop exit
PB: predicated region body
PF: predicated region fallthrough
CT: control target
= control target key end

     0   :  { %v210_v0 = vmov 1   ;;  %v211_v1 = vmov 0   ;;  %v212_v6 = vmov 2   ;;  %vm137_vm0 = vcmask 7168   ;;  %s362_s1 = inlined_call_operand.vmem [shape: f32[32,3], index: 1, kind: input, shape index: {}]   ;;  %s363_s2 = inlined_call_operand.vmem [shape: f32[32,1], index: 2, kind: input, shape index: {}]   ;;  %s364_s3 = inlined_call_operand.vmem [shape: f32[32,1], index: 3, kind: output, shape index: {0}]   ;;  %s365_s0 = inlined_call_operand.vmem [shape: f32[3,128], index: 0, kind: input, shape index: {}]   ;;  %s366_s4 = inlined_call_operand.vmem [shape: f32[32,1], index: 4, kind: output, shape index: {1}]  }
   0x1   :  { %204 = vset.pattern.permute.xlu0 %v210_v0  ;;  %203 = vset.pattern.permute.xlu1 %v211_v1  ;;  %v19_v2 = vld [vmem:[%s362_s1 + $0x10] sm:$0xff]  ;;  %v17_v3 = vld [vmem:[%s362_s1] sm:$0xff]  ;;  %v20_v4 = vld [vmem:[%s362_s1 + $0x18] sm:$0xff]  ;;  %v213_v11 = vmov 0.0   ;;  %v41_v14 = vlaneseq }
   0x2   :  { %33 = vperm.xlu1 %203, %v19_v2   ;;  %50 = vperm.xlu0 %204, %v17_v3   ;;  %v18_v5 = vld [vmem:[%s362_s1 + $0x8] sm:$0xff]  ;;  %v105_v7 = vld [vmem:[%s363_s2] sm:$0xff]  ;;  %v108_v8 = vld [vmem:[%s363_s2 + $0x18] sm:$0xff]  ;;  %138 = vst.msk [vmem:[%s364_s3] sm:$0xff] %vm137_vm0, %v213_v11 }
   0x3   :  { %v106_v9 = vld [vmem:[%s363_s2 + $0x8] sm:$0xff]  ;;  %v107_v10 = vld [vmem:[%s363_s2 + $0x10] sm:$0xff]  ;;  %139 = vst.msk [vmem:[%s364_s3 + $0x8] sm:$0xff] %vm137_vm0, %v213_v11  ;;  %140 = vst.msk [vmem:[%s364_s3 + $0x10] sm:$0xff] %vm137_vm0, %v213_v11  ;;  %v42_v16 = vshrl.u32 %v41_v14, 7 }
   0x4   :  { %141 = vst.msk [vmem:[%s364_s3 + $0x18] sm:$0xff] %vm137_vm0, %v213_v11  ;;  %v16_v21 = vld [vmem:[%s365_s0] sm:$0x7]  ;;  %143 = vst.msk [vmem:[%s366_s4 + $0x8] sm:$0xff] %vm137_vm0, %v213_v11 }
   0x5   :  { %v43_v18 = vsub.s32 0, %v42_v16  ;;  %v67_v22 = vsub.s32 1, %v42_v16  ;;  %v95_v24 = vsub.s32 2, %v42_v16  ;;  %142 = vst.msk [vmem:[%s366_s4] sm:$0xff] %vm137_vm0, %v213_v11  ;;  %144 = vst.msk [vmem:[%s366_s4 + $0x10] sm:$0xff] %vm137_vm0, %v213_v11 }
   0x6   :  { %38 = vperm.xlu1 %203, %v20_v4   ;;  %62 = vperm.xlu0 %204, %v20_v4   ;;  %145 = vst.msk [vmem:[%s366_s4 + $0x18] sm:$0xff] %vm137_vm0, %v213_v11 }
   0x7   :  { %v44_v23 = vrot.slane %v16_v21, %v43_v18  ;;  %v68_v27 = vrot.slane %v16_v21, %v67_v22  ;;  %v96_v30 = vrot.slane %v16_v21, %v95_v24 }
   0xa   :  { %205 = vset.pattern.permute.xlu1 %v210_v0  ;;  %207 = vset.pattern.permute.xlu0 %v212_v6  ;;  %v148_v11 = vld [vmem:[%s364_s3 + $0x10] sm:$0xff] }
   0xb   :  { %54 = vperm.xlu1 %205, %v18_v5   ;;  %82 = vperm.xlu0 %207, %v18_v5  }
   0xc   :  { %v169_v22 = vld [vmem:[%s366_s4 + $0x10] sm:$0xff] }
   0xd   :  { %v170_v16 = vld [vmem:[%s366_s4 + $0x18] sm:$0xff] }
   0xf   :  { %58 = vperm.xlu1 %205, %v19_v2   ;;  %208 = vset.pattern.permute.xlu0 %v211_v1 }
  0x10   :  { %23 = vperm.xlu0 %208, %v17_v3  }
  0x13   :  { %206 = vset.pattern.permute.xlu1 %v212_v6 }
  0x14   :  { %78 = vperm.xlu1 %206, %v17_v3   ;;  %28 = vperm.xlu0 %208, %v18_v5   ;;  %v147_v5 = vld [vmem:[%s364_s3 + $0x8] sm:$0xff] }
  0x18   :  { %86 = vperm.xlu1 %206, %v19_v2   ;;  %111 = vperm.xlu0 %208, %v105_v7  }
  0x1c   :  { %90 = vperm.xlu1 %206, %v20_v4   ;;  %126 = vperm.xlu0 %208, %v108_v8   ;;  %v149_v4 = vld [vmem:[%s364_s3 + $0x18] sm:$0xff] }
  0x20   :  { %209 = vset.pattern.permute.xlu1 %v211_v1  ;;  %v146_v1 = vld [vmem:[%s364_s3] sm:$0xff] }
  0x21   :  { %116 = vperm.xlu1 %209, %v106_v9  }
  0x25   :  { %121 = vperm.xlu1 %209, %v107_v10   ;;  %v168_v10 = vld [vmem:[%s366_s4 + $0x8] sm:$0xff] }
  0x7d   :  { %v34_v12 = vpop.permute.xlu1 %33  ;;  %v51_v13 = vpop.permute.xlu0 %50 }
  0x7e   :  { %v69_v29 = vmul.f32 %v68_v27, %v51_v13  ;;  %v47_v50 = vmul.f32 %v44_v23, %v34_v12 }
  0x81   :  { %v39_v15 = vpop.permute.xlu1 %38  ;;  %v63_v17 = vpop.permute.xlu0 %62 }
  0x82   :  { %v48_v39 = vmul.f32 %v44_v23, %v39_v15  ;;  %v72_v40 = vmul.f32 %v68_v27, %v63_v17  ;;  %v167_v17 = vld [vmem:[%s366_s4] sm:$0xff] }
  0x84   :  { %v76_v45 = vadd.f32 %v72_v40, %v48_v39 }
  0x86   :  { %v55_v19 = vpop.permute.xlu1 %54  ;;  %v83_v20 = vpop.permute.xlu0 %82 }
  0x87   :  { %v70_v42 = vmul.f32 %v68_v27, %v55_v19  ;;  %v98_v47 = vmul.f32 %v96_v30, %v83_v20 }
  0x8a   :  { %v59_v25 = vpop.permute.xlu1 %58 }
  0x8b   :  { %v24_v26 = vpop.permute.xlu0 %23  ;;  %v71_v48 = vmul.f32 %v68_v27, %v59_v25 }
  0x8c   :  { %v45_v28 = vmul.f32 %v44_v23, %v24_v26 }
  0x8d   :  { %v75_v56 = vadd.f32 %v71_v48, %v47_v50 }
  0x8e   :  { %v73_v33 = vadd.f32 %v69_v29, %v45_v28 }
  0x8f   :  { %v79_v31 = vpop.permute.xlu1 %78  ;;  %v29_v32 = vpop.permute.xlu0 %28 }
  0x90   :  { %v97_v34 = vmul.f32 %v96_v30, %v79_v31  ;;  %v46_v36 = vmul.f32 %v44_v23, %v29_v32 }
  0x92   :  { %v101_v35 = vadd.f32 %v97_v34, %v73_v33  ;;  %v74_v43 = vadd.f32 %v70_v42, %v46_v36 }
  0x93   :  { %v87_v37 = vpop.permute.xlu1 %86  ;;  %v112_v38 = vpop.permute.xlu0 %111 }
  0x94   :  { %v129_v41 = vadd.f32 %v112_v38, %v101_v35  ;;  %v99_v51 = vmul.f32 %v96_v30, %v87_v37  ;;  %v102_v53 = vadd.f32 %v98_v47, %v74_v43 }
  0x96   :  { %150 = vadd.xlane.f32.xlu1 %v129_v41  ;;  %v103_v58 = vadd.f32 %v99_v51, %v75_v56  ;;  %v171_v63 = vmul.f32 %v129_v41, %v129_v41 }
  0x97   :  { %v91_v44 = vpop.permute.xlu1 %90  ;;  %v127_v52 = vpop.permute.xlu0 %126 }
  0x98   :  { %v100_v46 = vmul.f32 %v96_v30, %v91_v44 }
  0x9a   :  { %v104_v49 = vadd.f32 %v100_v46, %v76_v45 }
  0x9c   :  { %v132_v54 = vadd.f32 %v127_v52, %v104_v49  ;;  %v117_v55 = vpop.permute.xlu1 %116 }
  0x9d   :  { %v130_v57 = vadd.f32 %v117_v55, %v102_v53 }
  0x9e   :  { %156 = vadd.xlane.f32.xlu1 %v132_v54  ;;  %v174_v62 = vmul.f32 %v132_v54, %v132_v54 }
  0x9f   :  { %152 = vadd.xlane.f32.xlu0 %v130_v57  ;;  %v172_v59 = vmul.f32 %v130_v57, %v130_v57 }
  0xa0   :  { %v122_v60 = vpop.permute.xlu1 %121 }
  0xa1   :  { %v131_v61 = vadd.f32 %v122_v60, %v103_v58 }
  0xa2   :  { %177 = vadd.xlane.f32.xlu1 %v172_v59 }
  0xa3   :  { %154 = vadd.xlane.f32.xlu0 %v131_v61  ;;  %v173_v0 = vmul.f32 %v131_v61, %v131_v61 }
  0xa6   :  { %181 = vadd.xlane.f32.xlu1 %v174_v62 }
  0xa7   :  { %175 = vadd.xlane.f32.xlu0 %v171_v63 }
  0xab   :  { %179 = vadd.xlane.f32.xlu0 %v173_v0 }
 0x11f   :  { %v151_v2 = vpop.xlane.xlu1 %150 }
 0x120   :  { %v158_v3 = vadd.f32 %v151_v2, %v146_v1 }
 0x122   :  { %163 = vst.msk [vmem:[%s364_s3] sm:$0xff] %vm137_vm0, %v158_v3 }
 0x127   :  { %v157_v6 = vpop.xlane.xlu1 %156 }
 0x128   :  { %v161_v7 = vadd.f32 %v157_v6, %v149_v4  ;;  %v153_v8 = vpop.xlane.xlu0 %152 }
 0x129   :  { %v159_v9 = vadd.f32 %v153_v8, %v147_v5 }
 0x12a   :  { %166 = vst.msk [vmem:[%s364_s3 + $0x18] sm:$0xff] %vm137_vm0, %v161_v7 }
 0x12b   :  { %164 = vst.msk [vmem:[%s364_s3 + $0x8] sm:$0xff] %vm137_vm0, %v159_v9  ;;  %v178_v12 = vpop.xlane.xlu1 %177 }
 0x12c   :  { %v184_v13 = vadd.f32 %v178_v12, %v168_v10  ;;  %v155_v14 = vpop.xlane.xlu0 %154 }
 0x12d   :  { %v160_v15 = vadd.f32 %v155_v14, %v148_v11 }
 0x12e   :  { %188 = vst.msk [vmem:[%s366_s4 + $0x8] sm:$0xff] %vm137_vm0, %v184_v13 }
 0x12f   :  { %165 = vst.msk [vmem:[%s364_s3 + $0x10] sm:$0xff] %vm137_vm0, %v160_v15  ;;  %v182_v18 = vpop.xlane.xlu1 %181 }
 0x130   :  { %v186_v19 = vadd.f32 %v182_v18, %v170_v16  ;;  %v176_v20 = vpop.xlane.xlu0 %175 }
 0x131   :  { %v183_v21 = vadd.f32 %v176_v20, %v167_v17 }
 0x132   :  { %190 = vst.msk [vmem:[%s366_s4 + $0x18] sm:$0xff] %vm137_vm0, %v186_v19 }
 0x133   :  { %187 = vst.msk [vmem:[%s366_s4] sm:$0xff] %vm137_vm0, %v183_v21 }
 0x134   :  { %v180_v23 = vpop.xlane.xlu0 %179 }
 0x135   :  { %v185_v24 = vadd.f32 %v180_v23, %v169_v22 }
 0x137   :  { %189 = vst.msk [vmem:[%s366_s4 + $0x10] sm:$0xff] %vm137_vm0, %v185_v24 }

// kernel: word_positional_encoder.5
= control target key start
LH: loop header
LB: loop body
LE: loop exit
PB: predicated region body
PF: predicated region fallthrough
CT: control target
= control target key end

     0   :  { %v748_v0 = vmov 1   ;;  %v749_v1 = vmov 0   ;;  %v750_v5 = vmov 2   ;;  %vm271_vm0 = vcmask 261120   ;;  %s1006_s1 = inlined_call_operand.vmem [shape: f32[32,3], index: 1, kind: input, shape index: {}]   ;;  %s1007_s4 = inlined_call_operand.vmem [shape: f32[32,1], index: 4, kind: input, shape index: {}]   ;;  %s1008_s7 = inlined_call_operand.vmem [shape: f32[32,1], index: 7, kind: input, shape index: {}]   ;;  %s1009_s9 = inlined_call_operand.vmem [shape: f32[32,1], index: 9, kind: input, shape index: {}]   ;;  %s1010_s5 = inlined_call_operand.vmem [shape: f32[64,1], index: 5, kind: input, shape index: {}]   ;;  %s1011_s8 = inlined_call_operand.vmem [shape: f32[64,1], index: 8, kind: input, shape index: {}]   ;;  %s1012_s10 = inlined_call_operand.vmem [shape: f32[64,1], index: 10, kind: input, shape index: {}]   ;;  %s1013_s2 = inlined_call_operand.vmem [shape: f32[64,32], index: 2, kind: input, shape index: {}]   ;;  %s1014_s6 = inlined_call_operand.vmem [shape: f32[32,1], index: 6, kind: input, shape index: {}]   ;;  %s1015_s0 = inlined_call_operand.vmem [shape: f32[3,128], index: 0, kind: input, shape index: {}]   ;;  %s1016_s3 = inlined_call_operand.vmem [shape: f32[32,64], index: 3, kind: input, shape index: {}]   ;;  %s1017_s11 = inlined_call_operand.vmem [shape: f32[32,128], index: 11, kind: output, shape index: {}]  }
   0x1   :  { %736 = vset.pattern.permute.xlu0 %v748_v0  ;;  %737 = vset.pattern.permute.xlu1 %v749_v1  ;;  %v42_v2 = vld [vmem:[%s1006_s1 + $0x18] sm:$0xff]  ;;  %v41_v3 = vld [vmem:[%s1006_s1 + $0x10] sm:$0xff]  ;;  %v40_v4 = vld [vmem:[%s1006_s1 + $0x8] sm:$0xff]  ;;  %v63_v56 = vlaneseq  ;;  %vm549_vm1 = vcmask 523264  }
   0x2   :  { %84 = vperm.xlu0 %736, %v42_v2   ;;  %55 = vperm.xlu1 %737, %v41_v3   ;;  %v39_v6 = vld [vmem:[%s1006_s1] sm:$0xff]  ;;  %v129_v7 = vld [vmem:[%s1007_s4 + $0x10] sm:$0xff]  ;;  %v130_v10 = vld [vmem:[%s1007_s4 + $0x18] sm:$0xff] }
   0x3   :  { %v157_v8 = vld [vmem:[%s1008_s7 + $0x10] sm:$0xff]  ;;  %v127_v9 = vld [vmem:[%s1007_s4] sm:$0xff]  ;;  %v184_v12 = vld [vmem:[%s1009_s9 + $0x8] sm:$0xff]  ;;  %v64_v59 = vshrl.u32 %v63_v56, 7 }
   0x4   :  { %v185_v11 = vld [vmem:[%s1009_s9 + $0x10] sm:$0xff]  ;;  %v158_v13 = vld [vmem:[%s1008_s7 + $0x18] sm:$0xff]  ;;  %v128_v15 = vld [vmem:[%s1007_s4 + $0x8] sm:$0xff] }
   0x5   :  { %v230_v14 = vld [vmem:[%s1010_s5 + $0x38] sm:$0xff]  ;;  %v407_v18 = vld [vmem:[%s1011_s8 + $0x30] sm:$0xff]  ;;  %v156_v19 = vld [vmem:[%s1008_s7 + $0x8] sm:$0xff]  ;;  %v89_v60 = vsub.s32 1, %v64_v59  ;;  %v65_v62 = vsub.s32 0, %v64_v59 }
   0x6   :  { %743 = vset.pattern.permute.xlu0 %v750_v5  ;;  %738 = vset.pattern.permute.xlu1 %v748_v0  ;;  %v408_v16 = vld [vmem:[%s1011_s8 + $0x38] sm:$0xff]  ;;  %v227_v20 = vld [vmem:[%s1010_s5 + $0x20] sm:$0xff]  ;;  %v463_v22 = vld [vmem:[%s1012_s10 + $0x30] sm:$0xff] }
   0x7   :  { %80 = vperm.xlu1 %738, %v41_v3   ;;  %104 = vperm.xlu0 %743, %v40_v4   ;;  %v186_v17 = vld [vmem:[%s1009_s9 + $0x18] sm:$0xff]  ;;  %v155_v21 = vld [vmem:[%s1008_s7] sm:$0xff]  ;;  %v229_v26 = vld [vmem:[%s1010_s5 + $0x30] sm:$0xff] }
   0x8   :  { %v183_v23 = vld [vmem:[%s1009_s9] sm:$0xff]  ;;  %v225_v27 = vld [vmem:[%s1010_s5 + $0x10] sm:$0xff]  ;;  %v228_v28 = vld [vmem:[%s1010_s5 + $0x28] sm:$0xff] }
   0x9   :  { %v405_v24 = vld [vmem:[%s1011_s8 + $0x20] sm:$0xff]  ;;  %v464_v30 = vld [vmem:[%s1012_s10 + $0x38] sm:$0xff]  ;;  %v403_v31 = vld [vmem:[%s1011_s8 + $0x10] sm:$0xff] }
   0xa   :  { %v215_v25 = vld [vmem:[%s1013_s2] sm:$0xff]  ;;  %v406_v32 = vld [vmem:[%s1011_s8 + $0x28] sm:$0xff]  ;;  %v226_v34 = vld [vmem:[%s1010_s5 + $0x18] sm:$0xff] }
   0xb   :  { %739 = vset.pattern.permute.xlu1 %v750_v5  ;;  %744 = vset.pattern.permute.xlu0 %v749_v1  ;;  %v461_v29 = vld [vmem:[%s1012_s10 + $0x20] sm:$0xff]  ;;  %v459_v35 = vld [vmem:[%s1012_s10 + $0x10] sm:$0xff]  ;;  %v462_v36 = vld [vmem:[%s1012_s10 + $0x28] sm:$0xff] }
   0xc   :  { %112 = vperm.xlu1 %739, %v42_v2   ;;  %60 = vperm.xlu0 %744, %v42_v2   ;;  %v223_v33 = vld [vmem:[%s1010_s5] sm:$0xff]  ;;  %v458_v37 = vld [vmem:[%s1012_s10 + $0x8] sm:$0xff]  ;;  %v404_v38 = vld [vmem:[%s1011_s8 + $0x18] sm:$0xff]  ;;  %v117_v2 = vsub.s32 2, %v64_v59 }
   0xd   :  { %699 = vmatprep.mubr.msk.f32.mxu0 %vm271_vm0, %v215_v25  ;;  %v525_v39 = vld [vmem:[%s1014_s6] sm:$0xff]  ;;  %v224_v40 = vld [vmem:[%s1010_s5 + $0x8] sm:$0xff]  ;;  %v527_v41 = vld [vmem:[%s1014_s6 + $0x10] sm:$0xff] }
   0xe   :  { %v460_v42 = vld [vmem:[%s1012_s10 + $0x18] sm:$0xff]  ;;  %v402_v43 = vld [vmem:[%s1011_s8 + $0x8] sm:$0xff]  ;;  %v401_v44 = vld [vmem:[%s1011_s8] sm:$0xff] }
   0xf   :  { %v457_v45 = vld [vmem:[%s1012_s10] sm:$0xff]  ;;  %v526_v46 = vld [vmem:[%s1014_s6 + $0x8] sm:$0xff]  ;;  %v528_v47 = vld [vmem:[%s1014_s6 + $0x18] sm:$0xff] }
  0x10   :  { %740 = vset.pattern.permute.xlu1 %v748_v0  ;;  %50 = vperm.xlu0 %744, %v40_v4   ;;  %v38_v63 = vld [vmem:[%s1015_s0] sm:$0x7]  ;;  %v222_v59 = vld [vmem:[%s1013_s2 + $0x38] sm:$0xff] }
  0x11   :  { %76 = vperm.xlu1 %740, %v40_v4   ;;  %v66_v4 = vrot.slane %v38_v63, %v65_v62  ;;  %v219_v56 = vld [vmem:[%s1013_s2 + $0x20] sm:$0xff] }
  0x14   :  { %45 = vperm.xlu0 %744, %v39_v6  }
  0x15   :  { %741 = vset.pattern.permute.xlu1 %v750_v5 }
  0x16   :  { %108 = vperm.xlu1 %741, %v41_v3  }
  0x18   :  { %143 = vperm.xlu0 %744, %v129_v7  }
  0x1a   :  { %742 = vset.pattern.permute.xlu1 %v748_v0 }
  0x1b   :  { %72 = vperm.xlu1 %742, %v39_v6  }
  0x1c   :  { %171 = vperm.xlu0 %744, %v157_v8  }
  0x1f   :  { %745 = vset.pattern.permute.xlu1 %v749_v1 }
  0x20   :  { %133 = vperm.xlu0 %744, %v127_v9   ;;  %148 = vperm.xlu1 %745, %v130_v10  }
  0x24   :  { %199 = vperm.xlu0 %744, %v185_v11   ;;  %746 = vset.pattern.permute.xlu1 %v750_v5 }
  0x25   :  { %100 = vperm.xlu1 %746, %v39_v6   ;;  %v118_v6 = vrot.slane %v38_v63, %v117_v2 }
  0x28   :  { %194 = vperm.xlu0 %744, %v184_v12  }
  0x29   :  { %747 = vset.pattern.permute.xlu1 %v749_v1  ;;  %v90_v1 = vrot.slane %v38_v63, %v89_v60  ;;  %v521_v60 = vld [vmem:[%s1016_s3] sm:$0xff] }
  0x2a   :  { %176 = vperm.xlu1 %747, %v158_v13   ;;  %727 = vmatprep.mubr.msk.f32.mxu1 %vm549_vm1, %v521_v60 }
  0x2c   :  { %268 = vperm.xlu0 %744, %v230_v14  }
  0x2e   :  { %138 = vperm.xlu1 %747, %v128_v15  }
  0x30   :  { %446 = vperm.xlu0 %744, %v408_v16  }
  0x32   :  { %204 = vperm.xlu1 %747, %v186_v17  }
  0x34   :  { %441 = vperm.xlu0 %744, %v407_v18  }
  0x36   :  { %166 = vperm.xlu1 %747, %v156_v19  }
  0x38   :  { %253 = vperm.xlu0 %744, %v227_v20  }
  0x3a   :  { %161 = vperm.xlu1 %747, %v155_v21  }
  0x3c   :  { %497 = vperm.xlu0 %744, %v463_v22  }
  0x3e   :  { %189 = vperm.xlu1 %747, %v183_v23  }
  0x40   :  { %431 = vperm.xlu0 %744, %v405_v24  }
  0x42   :  { %263 = vperm.xlu1 %747, %v229_v26  }
  0x44   :  { %243 = vperm.xlu0 %744, %v225_v27  }
  0x46   :  { %258 = vperm.xlu1 %747, %v228_v28  }
  0x48   :  { %487 = vperm.xlu0 %744, %v461_v29  }
  0x4a   :  { %502 = vperm.xlu1 %747, %v464_v30  }
  0x4c   :  { %421 = vperm.xlu0 %744, %v403_v31  }
  0x4e   :  { %436 = vperm.xlu1 %747, %v406_v32  }
  0x50   :  { %233 = vperm.xlu0 %744, %v223_v33  }
  0x52   :  { %248 = vperm.xlu1 %747, %v226_v34  }
  0x54   :  { %477 = vperm.xlu0 %744, %v459_v35  }
  0x56   :  { %492 = vperm.xlu1 %747, %v462_v36  }
  0x58   :  { %472 = vperm.xlu0 %744, %v458_v37  }
  0x5a   :  { %426 = vperm.xlu1 %747, %v404_v38  }
  0x5c   :  { %531 = vperm.xlu0 %744, %v525_v39  }
  0x5e   :  { %238 = vperm.xlu1 %747, %v224_v40  }
  0x60   :  { %541 = vperm.xlu0 %744, %v527_v41  }
  0x62   :  { %482 = vperm.xlu1 %747, %v460_v42  }
  0x66   :  { %416 = vperm.xlu1 %747, %v402_v43  }
  0x6a   :  { %411 = vperm.xlu1 %747, %v401_v44  }
  0x6e   :  { %467 = vperm.xlu1 %747, %v457_v45  }
  0x72   :  { %536 = vperm.xlu1 %747, %v526_v46  }
  0x76   :  { %546 = vperm.xlu1 %747, %v528_v47  }
  0x7d   :  { %v56_v48 = vpop.permute.xlu1 %55  ;;  %v85_v49 = vpop.permute.xlu0 %84 }
  0x7e   :  { %v69_v8 = vmul.f32 %v66_v4, %v56_v48  ;;  %v94_v9 = vmul.f32 %v90_v1, %v85_v49 }
  0x82   :  { %v81_v50 = vpop.permute.xlu1 %80  ;;  %v105_v51 = vpop.permute.xlu0 %104 }
  0x83   :  { %v93_v5 = vmul.f32 %v90_v1, %v81_v50  ;;  %v120_v24 = vmul.f32 %v118_v6, %v105_v51 }
  0x85   :  { %v97_v13 = vadd.f32 %v93_v5, %v69_v8 }
  0x87   :  { %v113_v52 = vpop.permute.xlu1 %112  ;;  %v61_v53 = vpop.permute.xlu0 %60 }
  0x88   :  { %v70_v10 = vmul.f32 %v66_v4, %v61_v53  ;;  %v122_v18 = vmul.f32 %v118_v6, %v113_v52  ;;  %v216_v53 = vld [vmem:[%s1013_s2 + $0x8] sm:$0xff] }
  0x8a   :  { %v98_v14 = vadd.f32 %v94_v9, %v70_v10 }
  0x8b   :  { %v51_v55 = vpop.permute.xlu0 %50 }
  0x8c   :  { %v77_v54 = vpop.permute.xlu1 %76  ;;  %v68_v19 = vmul.f32 %v66_v4, %v51_v55  ;;  %v126_v22 = vadd.f32 %v122_v18, %v98_v14  ;;  %v218_v55 = vld [vmem:[%s1013_s2 + $0x18] sm:$0xff] }
  0x8d   :  { %v92_v20 = vmul.f32 %v90_v1, %v77_v54  ;;  %v217_v54 = vld [vmem:[%s1013_s2 + $0x10] sm:$0xff] }
  0x8f   :  { %v46_v58 = vpop.permute.xlu0 %45  ;;  %v96_v25 = vadd.f32 %v92_v20, %v68_v19 }
  0x90   :  { %v67_v28 = vmul.f32 %v66_v4, %v46_v58  ;;  %v221_v58 = vld [vmem:[%s1013_s2 + $0x30] sm:$0xff] }
  0x91   :  { %v109_v57 = vpop.permute.xlu1 %108  ;;  %v124_v35 = vadd.f32 %v120_v24, %v96_v25 }
  0x92   :  { %v121_v11 = vmul.f32 %v118_v6, %v109_v57  ;;  %v220_v57 = vld [vmem:[%s1013_s2 + $0x28] sm:$0xff] }
  0x93   :  { %v144_v0 = vpop.permute.xlu0 %143 }
  0x94   :  { %v125_v15 = vadd.f32 %v121_v11, %v97_v13 }
  0x96   :  { %v73_v61 = vpop.permute.xlu1 %72  ;;  %v153_v21 = vadd.f32 %v144_v0, %v125_v15 }
  0x97   :  { %v172_v7 = vpop.permute.xlu0 %171  ;;  %v91_v29 = vmul.f32 %v90_v1, %v73_v61 }
  0x98   :  { %v181_v30 = vmul.f32 %v172_v7, %v153_v21 }
  0x99   :  { %v95_v37 = vadd.f32 %v91_v29, %v67_v28 }
  0x9b   :  { %v149_v3 = vpop.permute.xlu1 %148  ;;  %v134_v16 = vpop.permute.xlu0 %133 }
  0x9c   :  { %v154_v26 = vadd.f32 %v149_v3, %v126_v22 }
  0x9f   :  { %v200_v27 = vpop.permute.xlu0 %199 }
  0xa0   :  { %v101_v12 = vpop.permute.xlu1 %100  ;;  %v209_v33 = vadd.f32 %v200_v27, %v181_v30 }
  0xa1   :  { %v119_v34 = vmul.f32 %v118_v6, %v101_v12 }
  0xa2   :  { %v213_v41 = vmax.f32 %v209_v33, 0.0 }
  0xa3   :  { %v123_v42 = vadd.f32 %v119_v34, %v95_v37  ;;  %v195_v44 = vpop.permute.xlu0 %194 }
  0xa5   :  { %v177_v17 = vpop.permute.xlu1 %176  ;;  %v151_v48 = vadd.f32 %v134_v16, %v123_v42 }
  0xa6   :  { %v182_v31 = vmul.f32 %v177_v17, %v154_v26 }
  0xa7   :  { %v269_v61 = vpop.permute.xlu0 %268 }
  0xa9   :  { %v139_v23 = vpop.permute.xlu1 %138 }
  0xaa   :  { %v152_v38 = vadd.f32 %v139_v23, %v124_v35 }
  0xab   :  { %v447_v63 = vpop.permute.xlu0 %446 }
  0xad   :  { %v205_v32 = vpop.permute.xlu1 %204 }
  0xae   :  { %v210_v36 = vadd.f32 %v205_v32, %v182_v31 }
  0xaf   :  { %v442_v1 = vpop.permute.xlu0 %441 }
  0xb0   :  { %v214_v39 = vmax.f32 %v210_v36, 0.0 }
  0xb1   :  { %v167_v40 = vpop.permute.xlu1 %166 }
  0xb2   :  { %v180_v43 = vmul.f32 %v167_v40, %v152_v38  ;;  %691 = vmatprep.subr.mxu0 %v214_v39 }
  0xb3   :  { %692 = vmatpush3.msra.mxu0 %v214_v39  ;;  %v254_v3 = vpop.permute.xlu0 %253 }
  0xb4   :  { %v208_v45 = vadd.f32 %v195_v44, %v180_v43  ;;  %693 = vmatprep.subr.mxu0 %v213_v41 }
  0xb5   :  { %v162_v46 = vpop.permute.xlu1 %161  ;;  %694 = vmatpush3.msra.mxu0 %v213_v41 }
  0xb6   :  { %v212_v47 = vmax.f32 %v208_v45, 0.0  ;;  %v179_v49 = vmul.f32 %v162_v46, %v151_v48 }
  0xb7   :  { %v498_v5 = vpop.permute.xlu0 %497 }
  0xb8   :  { %695 = vmatprep.subr.mxu0 %v212_v47 }
  0xb9   :  { %v190_v50 = vpop.permute.xlu1 %189  ;;  %696 = vmatpush3.msra.mxu0 %v212_v47 }
  0xba   :  { %v207_v51 = vadd.f32 %v190_v50, %v179_v49 }
  0xbb   :  { %v432_v7 = vpop.permute.xlu0 %431 }
  0xbc   :  { %v211_v52 = vmax.f32 %v207_v51, 0.0 }
  0xbd   :  { %v264_v62 = vpop.permute.xlu1 %263 }
  0xbe   :  { %697 = vmatprep.subr.mxu0 %v211_v52 }
  0xbf   :  { %698 = vmatpush3.msra.mxu0 %v211_v52  ;;  %v244_v9 = vpop.permute.xlu0 %243 }
  0xc0   :  { %700 = vmatmul.mubr.msk.f32.vlgmr.msra.gmra.mxu0 %vm271_vm0, %v216_v53 }
  0xc1   :  { %702 = vmatprep.mubr.msk.f32.mxu0 %vm271_vm0, %v217_v54  ;;  %v259_v0 = vpop.permute.xlu1 %258 }
  0xc3   :  { %v488_v12 = vpop.permute.xlu0 %487 }
  0xc4   :  { %703 = vmatmul.mubr.msk.f32.gmra.mxu0 %vm271_vm0, %v218_v55 }
  0xc5   :  { %705 = vmatprep.mubr.msk.f32.mxu0 %vm271_vm0, %v219_v56  ;;  %v503_v2 = vpop.permute.xlu1 %502 }
  0xc7   :  { %v422_v17 = vpop.permute.xlu0 %421 }
  0xc8   :  { %706 = vmatmul.mubr.msk.f32.gmra.mxu0 %vm271_vm0, %v220_v57 }
  0xc9   :  { %708 = vmatprep.mubr.msk.f32.mxu0 %vm271_vm0, %v221_v58  ;;  %v437_v4 = vpop.permute.xlu1 %436 }
  0xcb   :  { %v234_v25 = vpop.permute.xlu0 %233 }
  0xcc   :  { %709 = vmatmul.mubr.msk.f32.gmra.mxu0 %vm271_vm0, %v222_v59 }
  0xcd   :  { %v249_v6 = vpop.permute.xlu1 %248 }
  0xcf   :  { %v478_v41 = vpop.permute.xlu0 %477 }
  0xd1   :  { %v493_v8 = vpop.permute.xlu1 %492 }
  0xd3   :  { %v473_v53 = vpop.permute.xlu0 %472 }
  0xd5   :  { %v427_v10 = vpop.permute.xlu1 %426 }
  0xd9   :  { %v239_v14 = vpop.permute.xlu1 %238 }
  0xdd   :  { %v483_v19 = vpop.permute.xlu1 %482 }
  0xe1   :  { %v417_v31 = vpop.permute.xlu1 %416 }
  0xe5   :  { %v412_v46 = vpop.permute.xlu1 %411 }
  0xe9   :  { %v468_v56 = vpop.permute.xlu1 %467 }
 0x180   :  { %v701_v11 = vpop.f32.mrf.mxu0 }
 0x181   :  { %v368_v36 = vadd.f32 %v701_v11, %v239_v14 }
 0x182   :  { %v362_v13 = vpop.f32.mrf.mxu0 }
 0x183   :  { %v363_v42 = vadd.f32 %v362_v13, %v234_v25  ;;  %v450_v47 = vmul.f32 %v417_v31, %v368_v36 }
 0x184   :  { %v704_v15 = vpop.f32.mrf.mxu0 }
 0x185   :  { %v378_v27 = vadd.f32 %v704_v15, %v249_v6  ;;  %v449_v50 = vmul.f32 %v412_v46, %v363_v42  ;;  %v506_v55 = vadd.f32 %v473_v53, %v450_v47 }
 0x186   :  { %v372_v16 = vpop.f32.mrf.mxu0 }
 0x187   :  { %v373_v32 = vadd.f32 %v372_v16, %v244_v9  ;;  %v452_v37 = vmul.f32 %v427_v10, %v378_v27  ;;  %v505_v58 = vadd.f32 %v468_v56, %v449_v50  ;;  %v514_v59 = vmax.f32 %v506_v55, 0.0 }
 0x188   :  { %v707_v18 = vpop.f32.mrf.mxu0 }
 0x189   :  { %v388_v21 = vadd.f32 %v707_v18, %v259_v0  ;;  %v451_v43 = vmul.f32 %v422_v17, %v373_v32  ;;  %v508_v49 = vadd.f32 %v483_v19, %v452_v37  ;;  %v513_v60 = vmax.f32 %v505_v58, 0.0  ;;  %v537_v0 = vpop.permute.xlu1 %536 }
 0x18a   :  { %v382_v20 = vpop.f32.mrf.mxu0 }
 0x18b   :  { %v383_v23 = vadd.f32 %v382_v20, %v254_v3  ;;  %v454_v28 = vmul.f32 %v437_v4, %v388_v21  ;;  %v507_v52 = vadd.f32 %v478_v41, %v451_v43  ;;  %v516_v54 = vmax.f32 %v508_v49, 0.0 }
 0x18c   :  { %v710_v22 = vpop.f32.mrf.mxu0 }
 0x18d   :  { %v398_v24 = vadd.f32 %v710_v22, %v269_v61  ;;  %v453_v33 = vmul.f32 %v432_v7, %v383_v23  ;;  %v510_v40 = vadd.f32 %v493_v8, %v454_v28  ;;  %v515_v57 = vmax.f32 %v507_v52, 0.0  ;;  %v522_v61 = vld [vmem:[%s1016_s3 + $0x8] sm:$0xff]  ;;  %v547_v6 = vpop.permute.xlu1 %546 }
 0x18e   :  { %v392_v26 = vpop.f32.mrf.mxu0 }
 0x18f   :  { %v456_v29 = vmul.f32 %v447_v63, %v398_v24  ;;  %v393_v30 = vadd.f32 %v392_v26, %v264_v62  ;;  %v509_v45 = vadd.f32 %v488_v12, %v453_v33  ;;  %v518_v48 = vmax.f32 %v510_v40, 0.0  ;;  %v523_v62 = vld [vmem:[%s1016_s3 + $0x10] sm:$0xff]  ;;  %v524_v63 = vld [vmem:[%s1016_s3 + $0x18] sm:$0xff] }
 0x191   :  { %v455_v34 = vmul.f32 %v442_v1, %v393_v30  ;;  %v512_v35 = vadd.f32 %v503_v2, %v456_v29  ;;  %v517_v51 = vmax.f32 %v509_v45, 0.0  ;;  %v532_v1 = vpop.permute.xlu0 %531 }
 0x193   :  { %v520_v38 = vmax.f32 %v512_v35, 0.0  ;;  %v511_v39 = vadd.f32 %v498_v5, %v455_v34 }
 0x195   :  { %711 = vmatprep.subr.mxu1 %v520_v38  ;;  %v519_v44 = vmax.f32 %v511_v39, 0.0  ;;  %v542_v9 = vpop.permute.xlu0 %541 }
 0x196   :  { %712 = vmatpush3.msra.mxu1 %v520_v38 }
 0x197   :  { %713 = vmatprep.subr.mxu1 %v519_v44 }
 0x198   :  { %714 = vmatpush3.msra.mxu1 %v519_v44 }
 0x199   :  { %715 = vmatprep.subr.mxu1 %v518_v48 }
 0x19a   :  { %716 = vmatpush3.msra.mxu1 %v518_v48 }
 0x19b   :  { %717 = vmatprep.subr.mxu1 %v517_v51 }
 0x19c   :  { %718 = vmatpush3.msra.mxu1 %v517_v51 }
 0x19d   :  { %719 = vmatprep.subr.mxu1 %v516_v54 }
 0x19e   :  { %720 = vmatpush3.msra.mxu1 %v516_v54 }
 0x19f   :  { %721 = vmatprep.subr.mxu1 %v515_v57 }
 0x1a0   :  { %722 = vmatpush3.msra.mxu1 %v515_v57 }
 0x1a1   :  { %723 = vmatprep.subr.mxu1 %v514_v59 }
 0x1a2   :  { %724 = vmatpush3.msra.mxu1 %v514_v59 }
 0x1a3   :  { %725 = vmatprep.subr.mxu1 %v513_v60 }
 0x1a4   :  { %726 = vmatpush3.msra.mxu1 %v513_v60 }
 0x1a5   :  { %728 = vmatmul.mubr.msk.f32.vlgmr.msra.gmra.mxu1 %vm549_vm1, %v522_v61 }
 0x1a6   :  { %730 = vmatprep.mubr.msk.f32.mxu1 %vm549_vm1, %v523_v62 }
 0x1a9   :  { %731 = vmatmul.mubr.msk.f32.gmra.mxu1 %vm549_vm1, %v524_v63 }
 0x265   :  { %v729_v2 = vpop.f32.mrf.mxu1 }
 0x266   :  { %v634_v3 = vadd.f32 %v729_v2, %v537_v0 }
 0x267   :  { %v628_v4 = vpop.f32.mrf.mxu1 }
 0x268   :  { %648 = vst [vmem:[%s1017_s11 + $0x8] sm:$0xff] %v634_v3  ;;  %v629_v5 = vadd.f32 %v628_v4, %v532_v1 }
 0x269   :  { %v732_v7 = vpop.f32.mrf.mxu1 }
 0x26a   :  { %647 = vst [vmem:[%s1017_s11] sm:$0xff] %v629_v5  ;;  %v644_v8 = vadd.f32 %v732_v7, %v547_v6 }
 0x26b   :  { %v638_v10 = vpop.f32.mrf.mxu1 }
 0x26c   :  { %650 = vst [vmem:[%s1017_s11 + $0x18] sm:$0xff] %v644_v8  ;;  %v639_v11 = vadd.f32 %v638_v10, %v542_v9 }
 0x26e   :  { %649 = vst [vmem:[%s1017_s11 + $0x10] sm:$0xff] %v639_v11 }

</bundles_post_ra>
